<compile_context>
chip_gen: v7x
topology: tpu7x:2x2x1
jax: 0.10.0
libtpu: 0.0.40
codegen_flags: <defaults>
</compile_context>

<pallas_src>
import functools

import jax
import jax.numpy as jnp
from jax.experimental import pallas as pl

# ----------------------------- config --------------------------------------
VOCAB = 64
EMBED = 32
NUM_HEADS = 2
HEAD_DIM = EMBED // NUM_HEADS
NUM_LAYERS = 2
CTX = 8
BATCH = 2
SEQ = 8
EPS = 1e-5
VPAD = 128                    # lane-dense padded vocab width for the output store
LAYER_SLAB = 4 * EMBED        # rows per layer in the packed bf16 weight blob (=128)


# --------------------------- blob layout ------------------------------------
def _f32_layout(vocab, bt, num_layers):
    """Row offsets inside the packed f32 blob (width VPAD).

    rows [0, vocab)                 : token embedding table      (cols 0:E)
    rows [pos_off, pos_off+bt)      : tiled positional embedding (cols 0:E)
    rows [vec_off + l*8 + 0..6]     : ln1_g, ln1_b, bo, ln2_g, ln2_b, b1, b2
    rows [fin_off + 0..2]           : ln_g, ln_b, b_head (b_head uses cols 0:V)
    """
    pos_off = vocab
    vec_off = ((pos_off + bt + 7) // 8) * 8
    fin_off = vec_off + num_layers * 8
    n_rows = ((fin_off + 3 + 7) // 8) * 8
    return pos_off, vec_off, fin_off, n_rows


# --------------------------- kernel helpers --------------------------------
def _layernorm(x, g, b):
    mu = jnp.mean(x, axis=-1, keepdims=True)
    var = jnp.mean((x - mu) ** 2, axis=-1, keepdims=True)
    return (x - mu) * jax.lax.rsqrt(var + EPS) * g + b


# --------------------------- fused forward kernel ---------------------------
def _lm_fused_kernel(tokens_ref, f32_ref, w_ref, o_ref, *,
                     vocab, embed, seq, num_layers, num_heads):
    bt = tokens_ref.shape[0]            # B*T rows, flattened batch
    E = embed
    D = E // num_heads
    pos_off, vec_off, fin_off, _ = _f32_layout(vocab, bt, num_layers)

    # ---- token embedding gather (one-hot on MXU, exact f32) + positional add
    tok = tokens_ref[...]                                           # (BT, 1) i32
    vocab_iota = jax.lax.broadcasted_iota(jnp.int32, (bt, vocab), 1)
    onehot = (vocab_iota == tok).astype(jnp.float32)                # (BT, V)
    x = jnp.dot(onehot, f32_ref[0:vocab, 0:E],
                preferred_element_type=jnp.float32)                 # (BT, E)
    x = x + f32_ref[pos_off:pos_off + bt, 0:E]

    # ---- block-diagonal causal mask, generated in-kernel (additive) --------
    row = jax.lax.broadcasted_iota(jnp.int32, (bt, bt), 0)
    col = jax.lax.broadcasted_iota(jnp.int32, (bt, bt), 1)
    if (seq & (seq - 1)) == 0:          # power-of-two seq -> use shifts (VPU)
        sh = seq.bit_length() - 1
        same_batch = (jax.lax.shift_right_logical(row, sh) ==
                      jax.lax.shift_right_logical(col, sh))
    else:
        same_batch = (row // seq) == (col // seq)
    allowed = (col <= row) & same_batch
    addmask = jnp.where(allowed, 0.0, -1e30)   # finite mask: no -inf NaN hazard

    # ---- transformer blocks (statically unrolled; all weights in VMEM) -----
    for l in range(num_layers):
        vr = vec_off + l * 8
        ln1g = f32_ref[vr + 0:vr + 1, 0:E]
        ln1b = f32_ref[vr + 1:vr + 2, 0:E]
        bo = f32_ref[vr + 2:vr + 3, 0:E]
        ln2g = f32_ref[vr + 3:vr + 4, 0:E]
        ln2b = f32_ref[vr + 4:vr + 5, 0:E]
        b1 = f32_ref[vr + 5:vr + 6, 0:E]
        b2 = f32_ref[vr + 6:vr + 7, 0:E]

        mr = l * LAYER_SLAB
        wqkv = w_ref[mr:mr + E, 0:3 * E]                 # (E, 3E) bf16
        wo = w_ref[mr + E:mr + 2 * E, 0:E]               # (E, E)  bf16
        w1 = w_ref[mr + 2 * E:mr + 3 * E, 0:E]
        w2 = w_ref[mr + 3 * E:mr + 4 * E, 0:E]

        # ln1 + fused-QKV multi-head causal attention (no 1/sqrt(d), as in Head)
        h = _layernorm(x, ln1g, ln1b).astype(jnp.bfloat16)
        qkv = jnp.dot(h, wqkv, preferred_element_type=jnp.float32)  # (BT, 3E)
        head_outs = []
        for hh in range(num_heads):
            qh = qkv[:, hh * D:(hh + 1) * D].astype(jnp.bfloat16)
            kh = qkv[:, E + hh * D:E + (hh + 1) * D].astype(jnp.bfloat16)
            vh = qkv[:, 2 * E + hh * D:2 * E + (hh + 1) * D].astype(jnp.bfloat16)
            s = jax.lax.dot_general(qh, kh, (((1,), (1,)), ((), ())),
                                    preferred_element_type=jnp.float32)  # (BT, BT)
            s = s + addmask
            s = s - jnp.max(s, axis=-1, keepdims=True)
            p = jnp.exp(s)
            p = p * pl.reciprocal(jnp.sum(p, axis=-1, keepdims=True), approx=True)
            head_outs.append(jnp.dot(p.astype(jnp.bfloat16), vh,
                                     preferred_element_type=jnp.float32))  # (BT, D)
        heads_cat = jnp.concatenate(head_outs, axis=-1).astype(jnp.bfloat16)
        attn = jnp.dot(heads_cat, wo, preferred_element_type=jnp.float32) + bo
        x = x + attn

        # ln2 + MLP (Linear -> ReLU -> Linear)
        h2 = _layernorm(x, ln2g, ln2b).astype(jnp.bfloat16)
        m = jnp.dot(h2, w1, preferred_element_type=jnp.float32) + b1
        m = jnp.maximum(m, 0.0).astype(jnp.bfloat16)
        m = jnp.dot(m, w2, preferred_element_type=jnp.float32) + b2
        x = x + m

    # ---- final LN + padded vocab head (lane-dense 128-wide store) ----------
    lnfg = f32_ref[fin_off + 0:fin_off + 1, 0:E]
    lnfb = f32_ref[fin_off + 1:fin_off + 2, 0:E]
    bh = f32_ref[fin_off + 2:fin_off + 3, :]                        # (1, VPAD)
    wh = w_ref[num_layers * LAYER_SLAB:num_layers * LAYER_SLAB + E, :]  # (E, VPAD) bf16
    hf = _layernorm(x, lnfg, lnfb).astype(jnp.bfloat16)
    o_ref[...] = jnp.dot(hf, wh, preferred_element_type=jnp.float32) + bh


# --------------------------- one-time weight packing -------------------------
def prepare_params(params, batch, seq):
    """Pack all weights into two VMEM-friendly blobs.  Called ONCE, outside the
    jitted per-call forward (hoists all layout work off the hot path)."""
    V, E = params["tok_emb"].shape
    L = len(params["blocks"])
    bt = batch * seq
    pos_off, vec_off, fin_off, n_rows = _f32_layout(V, bt, L)

    # f32 blob: embeddings, positional rows, all 1-row vectors, head bias.
    f32 = jnp.zeros((n_rows, VPAD), jnp.float32)
    f32 = f32.at[0:V, 0:E].set(params["tok_emb"])
    pos_bt = jnp.tile(params["pos_emb"][:seq], (batch, 1))          # (B*T, E)
    f32 = f32.at[pos_off:pos_off + bt, 0:E].set(pos_bt)
    for l, blk in enumerate(params["blocks"]):
        r = vec_off + l * 8
        for off, name in enumerate(("ln1_g", "ln1_b", "bo",
                                    "ln2_g", "ln2_b", "b1", "b2")):
            f32 = f32.at[r + off, 0:E].set(blk[name][0])
    f32 = f32.at[fin_off + 0, 0:E].set(params["ln_g"][0])
    f32 = f32.at[fin_off + 1, 0:E].set(params["ln_b"][0])
    f32 = f32.at[fin_off + 2, 0:V].set(params["b_head"][0])

    # bf16 blob: per-layer [Wqkv | Wo | W1 | W2] slabs + padded vocab head.
    w_rows = L * LAYER_SLAB + E
    w = jnp.zeros((w_rows, VPAD), jnp.float32)
    for l, blk in enumerate(params["blocks"]):
        mr = l * LAYER_SLAB
        wqkv = jnp.concatenate([blk["wq"], blk["wk"], blk["wv"]], axis=1)  # (E, 3E)
        w = w.at[mr:mr + E, 0:3 * E].set(wqkv)
        w = w.at[mr + E:mr + 2 * E, 0:E].set(blk["wo"])
        w = w.at[mr + 2 * E:mr + 3 * E, 0:E].set(blk["w1"])
        w = w.at[mr + 3 * E:mr + 4 * E, 0:E].set(blk["w2"])
    w = w.at[L * LAYER_SLAB:L * LAYER_SLAB + E, 0:V].set(params["w_head"])
    w = w.astype(jnp.bfloat16)

    return {"f32_blob": f32, "w_blob": w}


# --------------------------- wrapper ----------------------------------------
def language_model_forward(tokens, packed):
    B, T = tokens.shape
    BT = B * T
    tokens_2d = tokens.reshape(BT, 1).astype(jnp.int32)

    kernel = functools.partial(_lm_fused_kernel,
                               vocab=VOCAB, embed=EMBED, seq=T,
                               num_layers=NUM_LAYERS, num_heads=NUM_HEADS)

    out = pl.pallas_call(
        kernel,
        out_shape=jax.ShapeDtypeStruct((BT, VPAD), jnp.float32),
        # Single program, no grid: 3 input DMAs, everything VMEM-resident.
    )(tokens_2d, packed["f32_blob"], packed["w_blob"])

    return out.reshape(B, T, VPAD)[:, :, :VOCAB]


# --------------------------- parameter init ---------------------------------
def init_params(key):
    def nrm(k, shape, scale=0.02):
        return scale * jax.random.normal(k, shape, dtype=jnp.float32)

    keys = iter(jax.random.split(key, 8 + NUM_LAYERS * 16))
    params = {
        "tok_emb": nrm(next(keys), (VOCAB, EMBED), 1.0),
        "pos_emb": nrm(next(keys), (CTX, EMBED), 1.0),
        "ln_g": jnp.ones((1, EMBED), jnp.float32),
        "ln_b": jnp.zeros((1, EMBED), jnp.float32),
        "w_head": nrm(next(keys), (EMBED, VOCAB)),
        "b_head": nrm(next(keys), (1, VOCAB)),
        "blocks": [],
    }
    for _ in range(NUM_LAYERS):
        blk = {
            "ln1_g": jnp.ones((1, EMBED), jnp.float32),
            "ln1_b": jnp.zeros((1, EMBED), jnp.float32),
            "wq": nrm(next(keys), (EMBED, EMBED)),
            "wk": nrm(next(keys), (EMBED, EMBED)),
            "wv": nrm(next(keys), (EMBED, EMBED)),
            "wo": nrm(next(keys), (EMBED, EMBED)),
            "bo": nrm(next(keys), (1, EMBED)),
            "ln2_g": jnp.ones((1, EMBED), jnp.float32),
            "ln2_b": jnp.zeros((1, EMBED), jnp.float32),
            "w1": nrm(next(keys), (EMBED, EMBED)),
            "b1": nrm(next(keys), (1, EMBED)),
            "w2": nrm(next(keys), (EMBED, EMBED)),
            "b2": nrm(next(keys), (1, EMBED)),
        }
        params["blocks"].append(blk)
    return params


# --------------------------- pure-JAX reference ------------------------------
def _ref_forward(tokens, params):
    T = tokens.shape[1]
    x = params["tok_emb"][tokens] + params["pos_emb"][jnp.arange(T)][None]
    tril = jnp.tril(jnp.ones((T, T), jnp.float32))

    def ln(x, g, b):
        mu = x.mean(-1, keepdims=True)
        var = ((x - mu) ** 2).mean(-1, keepdims=True)
        return (x - mu) / jnp.sqrt(var + EPS) * g + b

    for p in params["blocks"]:
        h = ln(x, p["ln1_g"], p["ln1_b"])
        q, k, v = h @ p["wq"], h @ p["wk"], h @ p["wv"]
        outs = []
        for i in range(NUM_HEADS):
            sl = slice(i * HEAD_DIM, (i + 1) * HEAD_DIM)
            s = jnp.einsum("btd,bsd->bts", q[..., sl], k[..., sl])
            s = jnp.where(tril == 0, -jnp.inf, s)
            w = jax.nn.softmax(s, axis=-1)
            outs.append(jnp.einsum("bts,bsd->btd", w, v[..., sl]))
        attn = jnp.concatenate(outs, -1) @ p["wo"] + p["bo"]
        x = x + attn
        h2 = ln(x, p["ln2_g"], p["ln2_b"])
        m = jnp.maximum(h2 @ p["w1"] + p["b1"], 0.0) @ p["w2"] + p["b2"]
        x = x + m
    return ln(x, params["ln_g"], params["ln_b"]) @ params["w_head"] + params["b_head"]


# ------------------------------- main ----------------------------------------
if __name__ == "__main__":
    key = jax.random.PRNGKey(0)
    pkey, tkey = jax.random.split(key)
    params = init_params(pkey)
    tokens = jax.random.randint(tkey, (BATCH, SEQ), 0, VOCAB, dtype=jnp.int32)

    packed = prepare_params(params, BATCH, SEQ)   # one-time packing (off hot path)
    fwd = jax.jit(language_model_forward)
    logits = jax.block_until_ready(fwd(tokens, packed))
    ref = jax.block_until_ready(_ref_forward(tokens, params))

    assert logits.shape == (BATCH, SEQ, VOCAB)
    # Tolerance covers bf16 MXU operands + approx softmax reciprocal (f32 ref).
    assert jnp.allclose(logits, ref, atol=2e-2, rtol=2e-2), "mismatch vs JAX reference"
    # TODO(synk): cross-entropy loss path (targets), `generate` sampling and
    # `calculate_loss` masking are host-side glue in the original module and
    # are not part of the kernel hot path.
    print("KERNEL_OK")
</pallas_src>

<mosaic_0001>
module attributes {stable_mosaic.version = 11 : i64} {
  func.func @_lm_fused_kernel(%arg0: memref<16x1xi32, #tpu.memory_space<vmem>>, %arg1: memref<104x128xf32, #tpu.memory_space<vmem>>, %arg2: memref<288x128xbf16, #tpu.memory_space<vmem>>, %arg3: memref<16x128xf32, #tpu.memory_space<vmem>>) attributes {dimension_semantics = [], scalar_prefetch = 0 : i64, scratch_operands = 0 : i64, tpu.core_type = #tpu.core_type<tc>} {
    %c0 = arith.constant 0 : index
    %c0_0 = arith.constant 0 : index
    %0 = vector.load %arg0[%c0, %c0_0] : memref<16x1xi32, #tpu.memory_space<vmem>>, vector<16x1xi32>
    %1 = tpu.iota {dimensions = array<i32: 1>} : vector<16x64xi32>
    %2 = vector.broadcast %0 : vector<16x1xi32> to vector<16x64xi32>
    %3 = arith.cmpi eq, %1, %2 : vector<16x64xi32>
    %4 = arith.extui %3 : vector<16x64xi1> to vector<16x64xi32>
    %5 = arith.sitofp %4 : vector<16x64xi32> to vector<16x64xf32>
    %c0_1 = arith.constant 0 : index
    %c0_2 = arith.constant 0 : index
    %6 = vector.load %arg1[%c0_1, %c0_2] : memref<104x128xf32, #tpu.memory_space<vmem>>, vector<64x32xf32>
    %cst = arith.constant dense<0.000000e+00> : vector<16x32xf32>
    %7 = tpu.matmul %5, %6, %cst {dimension_numbers = #tpu.dot_dimension_numbers<[1], [0], [0], [1], [0, 0, 1, 1], [], []>} : vector<16x64xf32>, vector<64x32xf32>, vector<16x32xf32> -> vector<16x32xf32>
    %c64 = arith.constant 64 : index
    %c0_3 = arith.constant 0 : index
    %8 = vector.load %arg1[%c64, %c0_3] : memref<104x128xf32, #tpu.memory_space<vmem>>, vector<16x32xf32>
    %9 = arith.addf %7, %8 : vector<16x32xf32>
    %10 = tpu.iota {dimensions = array<i32: 0>} : vector<16x16xi32>
    %11 = tpu.iota {dimensions = array<i32: 1>} : vector<16x16xi32>
    %c3_i32 = arith.constant 3 : i32
    %12 = vector.broadcast %c3_i32 : i32 to vector<16x16xi32>
    %13 = arith.shrui %10, %12 : vector<16x16xi32>
    %c3_i32_4 = arith.constant 3 : i32
    %14 = vector.broadcast %c3_i32_4 : i32 to vector<16x16xi32>
    %15 = arith.shrui %11, %14 : vector<16x16xi32>
    %16 = arith.cmpi eq, %13, %15 : vector<16x16xi32>
    %17 = arith.cmpi sle, %11, %10 : vector<16x16xi32>
    %18 = arith.andi %17, %16 : vector<16x16xi1>
    %cst_5 = arith.constant 0.000000e+00 : f32
    %cst_6 = arith.constant -1.000000e+30 : f32
    %19 = vector.broadcast %cst_5 : f32 to vector<16x16xf32>
    %20 = vector.broadcast %cst_6 : f32 to vector<16x16xf32>
    %21 = arith.select %18, %19, %20 : vector<16x16xi1>, vector<16x16xf32>
    %c80 = arith.constant 80 : index
    %c0_7 = arith.constant 0 : index
    %22 = vector.load %arg1[%c80, %c0_7] : memref<104x128xf32, #tpu.memory_space<vmem>>, vector<1x32xf32>
    %c81 = arith.constant 81 : index
    %c0_8 = arith.constant 0 : index
    %23 = vector.load %arg1[%c81, %c0_8] : memref<104x128xf32, #tpu.memory_space<vmem>>, vector<1x32xf32>
    %c82 = arith.constant 82 : index
    %c0_9 = arith.constant 0 : index
    %24 = vector.load %arg1[%c82, %c0_9] : memref<104x128xf32, #tpu.memory_space<vmem>>, vector<1x32xf32>
    %c83 = arith.constant 83 : index
    %c0_10 = arith.constant 0 : index
    %25 = vector.load %arg1[%c83, %c0_10] : memref<104x128xf32, #tpu.memory_space<vmem>>, vector<1x32xf32>
    %c84 = arith.constant 84 : index
    %c0_11 = arith.constant 0 : index
    %26 = vector.load %arg1[%c84, %c0_11] : memref<104x128xf32, #tpu.memory_space<vmem>>, vector<1x32xf32>
    %c85 = arith.constant 85 : index
    %c0_12 = arith.constant 0 : index
    %27 = vector.load %arg1[%c85, %c0_12] : memref<104x128xf32, #tpu.memory_space<vmem>>, vector<1x32xf32>
    %c86 = arith.constant 86 : index
    %c0_13 = arith.constant 0 : index
    %28 = vector.load %arg1[%c86, %c0_13] : memref<104x128xf32, #tpu.memory_space<vmem>>, vector<1x32xf32>
    %c0_14 = arith.constant 0 : index
    %c0_15 = arith.constant 0 : index
    %29 = vector.load %arg2[%c0_14, %c0_15] : memref<288x128xbf16, #tpu.memory_space<vmem>>, vector<32x96xbf16>
    %c32 = arith.constant 32 : index
    %c0_16 = arith.constant 0 : index
    %30 = vector.load %arg2[%c32, %c0_16] : memref<288x128xbf16, #tpu.memory_space<vmem>>, vector<32x32xbf16>
    %c64_17 = arith.constant 64 : index
    %c0_18 = arith.constant 0 : index
    %31 = vector.load %arg2[%c64_17, %c0_18] : memref<288x128xbf16, #tpu.memory_space<vmem>>, vector<32x32xbf16>
    %c96 = arith.constant 96 : index
    %c0_19 = arith.constant 0 : index
    %32 = vector.load %arg2[%c96, %c0_19] : memref<288x128xbf16, #tpu.memory_space<vmem>>, vector<32x32xbf16>
    %cst_20 = arith.constant dense<0.000000e+00> : vector<16xf32>
    %33 = vector.multi_reduction <add>, %9, %cst_20 [1] : vector<16x32xf32> to vector<16xf32>
    %34 = vector.shape_cast %33 : vector<16xf32> to vector<16x1xf32>
    %cst_21 = arith.constant 3.200000e+01 : f32
    %35 = vector.broadcast %cst_21 : f32 to vector<16x1xf32>
    %36 = arith.divf %34, %35 : vector<16x1xf32>
    %37 = vector.broadcast %36 : vector<16x1xf32> to vector<16x32xf32>
    %38 = arith.subf %9, %37 : vector<16x32xf32>
    %39 = arith.mulf %38, %38 : vector<16x32xf32>
    %cst_22 = arith.constant dense<0.000000e+00> : vector<16xf32>
    %40 = vector.multi_reduction <add>, %39, %cst_22 [1] : vector<16x32xf32> to vector<16xf32>
    %41 = vector.shape_cast %40 : vector<16xf32> to vector<16x1xf32>
    %cst_23 = arith.constant 3.200000e+01 : f32
    %42 = vector.broadcast %cst_23 : f32 to vector<16x1xf32>
    %43 = arith.divf %41, %42 : vector<16x1xf32>
    %44 = vector.broadcast %36 : vector<16x1xf32> to vector<16x32xf32>
    %45 = arith.subf %9, %44 : vector<16x32xf32>
    %cst_24 = arith.constant 9.99999974E-6 : f32
    %46 = vector.broadcast %cst_24 : f32 to vector<16x1xf32>
    %47 = arith.addf %43, %46 : vector<16x1xf32>
    %48 = math.rsqrt %47 : vector<16x1xf32>
    %49 = vector.broadcast %48 : vector<16x1xf32> to vector<16x32xf32>
    %50 = arith.mulf %45, %49 : vector<16x32xf32>
    %51 = vector.broadcast %22 : vector<1x32xf32> to vector<16x32xf32>
    %52 = arith.mulf %50, %51 : vector<16x32xf32>
    %53 = vector.broadcast %23 : vector<1x32xf32> to vector<16x32xf32>
    %54 = arith.addf %52, %53 : vector<16x32xf32>
    %55 = arith.truncf %54 : vector<16x32xf32> to vector<16x32xbf16>
    %cst_25 = arith.constant dense<0.000000e+00> : vector<16x96xf32>
    %56 = tpu.matmul %55, %29, %cst_25 {dimension_numbers = #tpu.dot_dimension_numbers<[1], [0], [0], [1], [0, 0, 1, 1], [], []>} : vector<16x32xbf16>, vector<32x96xbf16>, vector<16x96xf32> -> vector<16x96xf32>
    %57 = vector.extract_strided_slice %56 {offsets = [0, 0], sizes = [16, 16], strides = [1, 1]} : vector<16x96xf32> to vector<16x16xf32>
    %58 = arith.truncf %57 : vector<16x16xf32> to vector<16x16xbf16>
    %59 = vector.extract_strided_slice %56 {offsets = [0, 32], sizes = [16, 16], strides = [1, 1]} : vector<16x96xf32> to vector<16x16xf32>
    %60 = arith.truncf %59 : vector<16x16xf32> to vector<16x16xbf16>
    %61 = vector.extract_strided_slice %56 {offsets = [0, 64], sizes = [16, 16], strides = [1, 1]} : vector<16x96xf32> to vector<16x16xf32>
    %62 = arith.truncf %61 : vector<16x16xf32> to vector<16x16xbf16>
    %cst_26 = arith.constant dense<0.000000e+00> : vector<16x16xf32>
    %63 = tpu.matmul %58, %60, %cst_26 {dimension_numbers = #tpu.dot_dimension_numbers<[1], [1], [0], [0], [0, 0, 1, 0], [], []>} : vector<16x16xbf16>, vector<16x16xbf16>, vector<16x16xf32> -> vector<16x16xf32>
    %64 = arith.addf %63, %21 : vector<16x16xf32>
    %cst_27 = arith.constant dense<0xFF800000> : vector<16xf32>
    %65 = vector.multi_reduction <maximumf>, %64, %cst_27 [1] : vector<16x16xf32> to vector<16xf32>
    %66 = vector.shape_cast %65 : vector<16xf32> to vector<16x1xf32>
    %67 = vector.broadcast %66 : vector<16x1xf32> to vector<16x16xf32>
    %68 = arith.subf %64, %67 : vector<16x16xf32>
    %69 = math.exp %68 : vector<16x16xf32>
    %cst_28 = arith.constant dense<0.000000e+00> : vector<16xf32>
    %70 = vector.multi_reduction <add>, %69, %cst_28 [1] : vector<16x16xf32> to vector<16xf32>
    %71 = vector.shape_cast %70 : vector<16xf32> to vector<16x1xf32>
    %72 = tpu.reciprocal %71 {approx = true} : vector<16x1xf32> -> vector<16x1xf32>
    %73 = vector.broadcast %72 : vector<16x1xf32> to vector<16x16xf32>
    %74 = arith.mulf %69, %73 : vector<16x16xf32>
    %75 = arith.truncf %74 : vector<16x16xf32> to vector<16x16xbf16>
    %cst_29 = arith.constant dense<0.000000e+00> : vector<16x16xf32>
    %76 = tpu.matmul %75, %62, %cst_29 {dimension_numbers = #tpu.dot_dimension_numbers<[1], [0], [0], [1], [0, 0, 1, 1], [], []>} : vector<16x16xbf16>, vector<16x16xbf16>, vector<16x16xf32> -> vector<16x16xf32>
    %77 = vector.extract_strided_slice %56 {offsets = [0, 16], sizes = [16, 16], strides = [1, 1]} : vector<16x96xf32> to vector<16x16xf32>
    %78 = arith.truncf %77 : vector<16x16xf32> to vector<16x16xbf16>
    %79 = vector.extract_strided_slice %56 {offsets = [0, 48], sizes = [16, 16], strides = [1, 1]} : vector<16x96xf32> to vector<16x16xf32>
    %80 = arith.truncf %79 : vector<16x16xf32> to vector<16x16xbf16>
    %81 = vector.extract_strided_slice %56 {offsets = [0, 80], sizes = [16, 16], strides = [1, 1]} : vector<16x96xf32> to vector<16x16xf32>
    %82 = arith.truncf %81 : vector<16x16xf32> to vector<16x16xbf16>
    %cst_30 = arith.constant dense<0.000000e+00> : vector<16x16xf32>
    %83 = tpu.matmul %78, %80, %cst_30 {dimension_numbers = #tpu.dot_dimension_numbers<[1], [1], [0], [0], [0, 0, 1, 0], [], []>} : vector<16x16xbf16>, vector<16x16xbf16>, vector<16x16xf32> -> vector<16x16xf32>
    %84 = arith.addf %83, %21 : vector<16x16xf32>
    %cst_31 = arith.constant dense<0xFF800000> : vector<16xf32>
    %85 = vector.multi_reduction <maximumf>, %84, %cst_31 [1] : vector<16x16xf32> to vector<16xf32>
    %86 = vector.shape_cast %85 : vector<16xf32> to vector<16x1xf32>
    %87 = vector.broadcast %86 : vector<16x1xf32> to vector<16x16xf32>
    %88 = arith.subf %84, %87 : vector<16x16xf32>
    %89 = math.exp %88 : vector<16x16xf32>
    %cst_32 = arith.constant dense<0.000000e+00> : vector<16xf32>
    %90 = vector.multi_reduction <add>, %89, %cst_32 [1] : vector<16x16xf32> to vector<16xf32>
    %91 = vector.shape_cast %90 : vector<16xf32> to vector<16x1xf32>
    %92 = tpu.reciprocal %91 {approx = true} : vector<16x1xf32> -> vector<16x1xf32>
    %93 = vector.broadcast %92 : vector<16x1xf32> to vector<16x16xf32>
    %94 = arith.mulf %89, %93 : vector<16x16xf32>
    %95 = arith.truncf %94 : vector<16x16xf32> to vector<16x16xbf16>
    %cst_33 = arith.constant dense<0.000000e+00> : vector<16x16xf32>
    %96 = tpu.matmul %95, %82, %cst_33 {dimension_numbers = #tpu.dot_dimension_numbers<[1], [0], [0], [1], [0, 0, 1, 1], [], []>} : vector<16x16xbf16>, vector<16x16xbf16>, vector<16x16xf32> -> vector<16x16xf32>
    %97 = tpu.concatenate %76, %96 in 1 : vector<16x16xf32>, vector<16x16xf32> -> vector<16x32xf32>
    %98 = arith.truncf %97 : vector<16x32xf32> to vector<16x32xbf16>
    %cst_34 = arith.constant dense<0.000000e+00> : vector<16x32xf32>
    %99 = tpu.matmul %98, %30, %cst_34 {dimension_numbers = #tpu.dot_dimension_numbers<[1], [0], [0], [1], [0, 0, 1, 1], [], []>} : vector<16x32xbf16>, vector<32x32xbf16>, vector<16x32xf32> -> vector<16x32xf32>
    %100 = vector.broadcast %24 : vector<1x32xf32> to vector<16x32xf32>
    %101 = arith.addf %99, %100 : vector<16x32xf32>
    %102 = arith.addf %9, %101 : vector<16x32xf32>
    %cst_35 = arith.constant dense<0.000000e+00> : vector<16xf32>
    %103 = vector.multi_reduction <add>, %102, %cst_35 [1] : vector<16x32xf32> to vector<16xf32>
    %104 = vector.shape_cast %103 : vector<16xf32> to vector<16x1xf32>
    %cst_36 = arith.constant 3.200000e+01 : f32
    %105 = vector.broadcast %cst_36 : f32 to vector<16x1xf32>
    %106 = arith.divf %104, %105 : vector<16x1xf32>
    %107 = vector.broadcast %106 : vector<16x1xf32> to vector<16x32xf32>
    %108 = arith.subf %102, %107 : vector<16x32xf32>
    %109 = arith.mulf %108, %108 : vector<16x32xf32>
    %cst_37 = arith.constant dense<0.000000e+00> : vector<16xf32>
    %110 = vector.multi_reduction <add>, %109, %cst_37 [1] : vector<16x32xf32> to vector<16xf32>
    %111 = vector.shape_cast %110 : vector<16xf32> to vector<16x1xf32>
    %cst_38 = arith.constant 3.200000e+01 : f32
    %112 = vector.broadcast %cst_38 : f32 to vector<16x1xf32>
    %113 = arith.divf %111, %112 : vector<16x1xf32>
    %114 = vector.broadcast %106 : vector<16x1xf32> to vector<16x32xf32>
    %115 = arith.subf %102, %114 : vector<16x32xf32>
    %cst_39 = arith.constant 9.99999974E-6 : f32
    %116 = vector.broadcast %cst_39 : f32 to vector<16x1xf32>
    %117 = arith.addf %113, %116 : vector<16x1xf32>
    %118 = math.rsqrt %117 : vector<16x1xf32>
    %119 = vector.broadcast %118 : vector<16x1xf32> to vector<16x32xf32>
    %120 = arith.mulf %115, %119 : vector<16x32xf32>
    %121 = vector.broadcast %25 : vector<1x32xf32> to vector<16x32xf32>
    %122 = arith.mulf %120, %121 : vector<16x32xf32>
    %123 = vector.broadcast %26 : vector<1x32xf32> to vector<16x32xf32>
    %124 = arith.addf %122, %123 : vector<16x32xf32>
    %125 = arith.truncf %124 : vector<16x32xf32> to vector<16x32xbf16>
    %cst_40 = arith.constant dense<0.000000e+00> : vector<16x32xf32>
    %126 = tpu.matmul %125, %31, %cst_40 {dimension_numbers = #tpu.dot_dimension_numbers<[1], [0], [0], [1], [0, 0, 1, 1], [], []>} : vector<16x32xbf16>, vector<32x32xbf16>, vector<16x32xf32> -> vector<16x32xf32>
    %127 = vector.broadcast %27 : vector<1x32xf32> to vector<16x32xf32>
    %128 = arith.addf %126, %127 : vector<16x32xf32>
    %cst_41 = arith.constant 0.000000e+00 : f32
    %129 = vector.broadcast %cst_41 : f32 to vector<16x32xf32>
    %130 = arith.maximumf %128, %129 : vector<16x32xf32>
    %131 = arith.truncf %130 : vector<16x32xf32> to vector<16x32xbf16>
    %cst_42 = arith.constant dense<0.000000e+00> : vector<16x32xf32>
    %132 = tpu.matmul %131, %32, %cst_42 {dimension_numbers = #tpu.dot_dimension_numbers<[1], [0], [0], [1], [0, 0, 1, 1], [], []>} : vector<16x32xbf16>, vector<32x32xbf16>, vector<16x32xf32> -> vector<16x32xf32>
    %133 = vector.broadcast %28 : vector<1x32xf32> to vector<16x32xf32>
    %134 = arith.addf %132, %133 : vector<16x32xf32>
    %135 = arith.addf %102, %134 : vector<16x32xf32>
    %c88 = arith.constant 88 : index
    %c0_43 = arith.constant 0 : index
    %136 = vector.load %arg1[%c88, %c0_43] : memref<104x128xf32, #tpu.memory_space<vmem>>, vector<1x32xf32>
    %c89 = arith.constant 89 : index
    %c0_44 = arith.constant 0 : index
    %137 = vector.load %arg1[%c89, %c0_44] : memref<104x128xf32, #tpu.memory_space<vmem>>, vector<1x32xf32>
    %c90 = arith.constant 90 : index
    %c0_45 = arith.constant 0 : index
    %138 = vector.load %arg1[%c90, %c0_45] : memref<104x128xf32, #tpu.memory_space<vmem>>, vector<1x32xf32>
    %c91 = arith.constant 91 : index
    %c0_46 = arith.constant 0 : index
    %139 = vector.load %arg1[%c91, %c0_46] : memref<104x128xf32, #tpu.memory_space<vmem>>, vector<1x32xf32>
    %c92 = arith.constant 92 : index
    %c0_47 = arith.constant 0 : index
    %140 = vector.load %arg1[%c92, %c0_47] : memref<104x128xf32, #tpu.memory_space<vmem>>, vector<1x32xf32>
    %c93 = arith.constant 93 : index
    %c0_48 = arith.constant 0 : index
    %141 = vector.load %arg1[%c93, %c0_48] : memref<104x128xf32, #tpu.memory_space<vmem>>, vector<1x32xf32>
    %c94 = arith.constant 94 : index
    %c0_49 = arith.constant 0 : index
    %142 = vector.load %arg1[%c94, %c0_49] : memref<104x128xf32, #tpu.memory_space<vmem>>, vector<1x32xf32>
    %c128 = arith.constant 128 : index
    %c0_50 = arith.constant 0 : index
    %143 = vector.load %arg2[%c128, %c0_50] : memref<288x128xbf16, #tpu.memory_space<vmem>>, vector<32x96xbf16>
    %c160 = arith.constant 160 : index
    %c0_51 = arith.constant 0 : index
    %144 = vector.load %arg2[%c160, %c0_51] : memref<288x128xbf16, #tpu.memory_space<vmem>>, vector<32x32xbf16>
    %c192 = arith.constant 192 : index
    %c0_52 = arith.constant 0 : index
    %145 = vector.load %arg2[%c192, %c0_52] : memref<288x128xbf16, #tpu.memory_space<vmem>>, vector<32x32xbf16>
    %c224 = arith.constant 224 : index
    %c0_53 = arith.constant 0 : index
    %146 = vector.load %arg2[%c224, %c0_53] : memref<288x128xbf16, #tpu.memory_space<vmem>>, vector<32x32xbf16>
    %cst_54 = arith.constant dense<0.000000e+00> : vector<16xf32>
    %147 = vector.multi_reduction <add>, %135, %cst_54 [1] : vector<16x32xf32> to vector<16xf32>
    %148 = vector.shape_cast %147 : vector<16xf32> to vector<16x1xf32>
    %cst_55 = arith.constant 3.200000e+01 : f32
    %149 = vector.broadcast %cst_55 : f32 to vector<16x1xf32>
    %150 = arith.divf %148, %149 : vector<16x1xf32>
    %151 = vector.broadcast %150 : vector<16x1xf32> to vector<16x32xf32>
    %152 = arith.subf %135, %151 : vector<16x32xf32>
    %153 = arith.mulf %152, %152 : vector<16x32xf32>
    %cst_56 = arith.constant dense<0.000000e+00> : vector<16xf32>
    %154 = vector.multi_reduction <add>, %153, %cst_56 [1] : vector<16x32xf32> to vector<16xf32>
    %155 = vector.shape_cast %154 : vector<16xf32> to vector<16x1xf32>
    %cst_57 = arith.constant 3.200000e+01 : f32
    %156 = vector.broadcast %cst_57 : f32 to vector<16x1xf32>
    %157 = arith.divf %155, %156 : vector<16x1xf32>
    %158 = vector.broadcast %150 : vector<16x1xf32> to vector<16x32xf32>
    %159 = arith.subf %135, %158 : vector<16x32xf32>
    %cst_58 = arith.constant 9.99999974E-6 : f32
    %160 = vector.broadcast %cst_58 : f32 to vector<16x1xf32>
    %161 = arith.addf %157, %160 : vector<16x1xf32>
    %162 = math.rsqrt %161 : vector<16x1xf32>
    %163 = vector.broadcast %162 : vector<16x1xf32> to vector<16x32xf32>
    %164 = arith.mulf %159, %163 : vector<16x32xf32>
    %165 = vector.broadcast %136 : vector<1x32xf32> to vector<16x32xf32>
    %166 = arith.mulf %164, %165 : vector<16x32xf32>
    %167 = vector.broadcast %137 : vector<1x32xf32> to vector<16x32xf32>
    %168 = arith.addf %166, %167 : vector<16x32xf32>
    %169 = arith.truncf %168 : vector<16x32xf32> to vector<16x32xbf16>
    %cst_59 = arith.constant dense<0.000000e+00> : vector<16x96xf32>
    %170 = tpu.matmul %169, %143, %cst_59 {dimension_numbers = #tpu.dot_dimension_numbers<[1], [0], [0], [1], [0, 0, 1, 1], [], []>} : vector<16x32xbf16>, vector<32x96xbf16>, vector<16x96xf32> -> vector<16x96xf32>
    %171 = vector.extract_strided_slice %170 {offsets = [0, 0], sizes = [16, 16], strides = [1, 1]} : vector<16x96xf32> to vector<16x16xf32>
    %172 = arith.truncf %171 : vector<16x16xf32> to vector<16x16xbf16>
    %173 = vector.extract_strided_slice %170 {offsets = [0, 32], sizes = [16, 16], strides = [1, 1]} : vector<16x96xf32> to vector<16x16xf32>
    %174 = arith.truncf %173 : vector<16x16xf32> to vector<16x16xbf16>
    %175 = vector.extract_strided_slice %170 {offsets = [0, 64], sizes = [16, 16], strides = [1, 1]} : vector<16x96xf32> to vector<16x16xf32>
    %176 = arith.truncf %175 : vector<16x16xf32> to vector<16x16xbf16>
    %cst_60 = arith.constant dense<0.000000e+00> : vector<16x16xf32>
    %177 = tpu.matmul %172, %174, %cst_60 {dimension_numbers = #tpu.dot_dimension_numbers<[1], [1], [0], [0], [0, 0, 1, 0], [], []>} : vector<16x16xbf16>, vector<16x16xbf16>, vector<16x16xf32> -> vector<16x16xf32>
    %178 = arith.addf %177, %21 : vector<16x16xf32>
    %cst_61 = arith.constant dense<0xFF800000> : vector<16xf32>
    %179 = vector.multi_reduction <maximumf>, %178, %cst_61 [1] : vector<16x16xf32> to vector<16xf32>
    %180 = vector.shape_cast %179 : vector<16xf32> to vector<16x1xf32>
    %181 = vector.broadcast %180 : vector<16x1xf32> to vector<16x16xf32>
    %182 = arith.subf %178, %181 : vector<16x16xf32>
    %183 = math.exp %182 : vector<16x16xf32>
    %cst_62 = arith.constant dense<0.000000e+00> : vector<16xf32>
    %184 = vector.multi_reduction <add>, %183, %cst_62 [1] : vector<16x16xf32> to vector<16xf32>
    %185 = vector.shape_cast %184 : vector<16xf32> to vector<16x1xf32>
    %186 = tpu.reciprocal %185 {approx = true} : vector<16x1xf32> -> vector<16x1xf32>
    %187 = vector.broadcast %186 : vector<16x1xf32> to vector<16x16xf32>
    %188 = arith.mulf %183, %187 : vector<16x16xf32>
    %189 = arith.truncf %188 : vector<16x16xf32> to vector<16x16xbf16>
    %cst_63 = arith.constant dense<0.000000e+00> : vector<16x16xf32>
    %190 = tpu.matmul %189, %176, %cst_63 {dimension_numbers = #tpu.dot_dimension_numbers<[1], [0], [0], [1], [0, 0, 1, 1], [], []>} : vector<16x16xbf16>, vector<16x16xbf16>, vector<16x16xf32> -> vector<16x16xf32>
    %191 = vector.extract_strided_slice %170 {offsets = [0, 16], sizes = [16, 16], strides = [1, 1]} : vector<16x96xf32> to vector<16x16xf32>
    %192 = arith.truncf %191 : vector<16x16xf32> to vector<16x16xbf16>
    %193 = vector.extract_strided_slice %170 {offsets = [0, 48], sizes = [16, 16], strides = [1, 1]} : vector<16x96xf32> to vector<16x16xf32>
    %194 = arith.truncf %193 : vector<16x16xf32> to vector<16x16xbf16>
    %195 = vector.extract_strided_slice %170 {offsets = [0, 80], sizes = [16, 16], strides = [1, 1]} : vector<16x96xf32> to vector<16x16xf32>
    %196 = arith.truncf %195 : vector<16x16xf32> to vector<16x16xbf16>
    %cst_64 = arith.constant dense<0.000000e+00> : vector<16x16xf32>
    %197 = tpu.matmul %192, %194, %cst_64 {dimension_numbers = #tpu.dot_dimension_numbers<[1], [1], [0], [0], [0, 0, 1, 0], [], []>} : vector<16x16xbf16>, vector<16x16xbf16>, vector<16x16xf32> -> vector<16x16xf32>
    %198 = arith.addf %197, %21 : vector<16x16xf32>
    %cst_65 = arith.constant dense<0xFF800000> : vector<16xf32>
    %199 = vector.multi_reduction <maximumf>, %198, %cst_65 [1] : vector<16x16xf32> to vector<16xf32>
    %200 = vector.shape_cast %199 : vector<16xf32> to vector<16x1xf32>
    %201 = vector.broadcast %200 : vector<16x1xf32> to vector<16x16xf32>
    %202 = arith.subf %198, %201 : vector<16x16xf32>
    %203 = math.exp %202 : vector<16x16xf32>
    %cst_66 = arith.constant dense<0.000000e+00> : vector<16xf32>
    %204 = vector.multi_reduction <add>, %203, %cst_66 [1] : vector<16x16xf32> to vector<16xf32>
    %205 = vector.shape_cast %204 : vector<16xf32> to vector<16x1xf32>
    %206 = tpu.reciprocal %205 {approx = true} : vector<16x1xf32> -> vector<16x1xf32>
    %207 = vector.broadcast %206 : vector<16x1xf32> to vector<16x16xf32>
    %208 = arith.mulf %203, %207 : vector<16x16xf32>
    %209 = arith.truncf %208 : vector<16x16xf32> to vector<16x16xbf16>
    %cst_67 = arith.constant dense<0.000000e+00> : vector<16x16xf32>
    %210 = tpu.matmul %209, %196, %cst_67 {dimension_numbers = #tpu.dot_dimension_numbers<[1], [0], [0], [1], [0, 0, 1, 1], [], []>} : vector<16x16xbf16>, vector<16x16xbf16>, vector<16x16xf32> -> vector<16x16xf32>
    %211 = tpu.concatenate %190, %210 in 1 : vector<16x16xf32>, vector<16x16xf32> -> vector<16x32xf32>
    %212 = arith.truncf %211 : vector<16x32xf32> to vector<16x32xbf16>
    %cst_68 = arith.constant dense<0.000000e+00> : vector<16x32xf32>
    %213 = tpu.matmul %212, %144, %cst_68 {dimension_numbers = #tpu.dot_dimension_numbers<[1], [0], [0], [1], [0, 0, 1, 1], [], []>} : vector<16x32xbf16>, vector<32x32xbf16>, vector<16x32xf32> -> vector<16x32xf32>
    %214 = vector.broadcast %138 : vector<1x32xf32> to vector<16x32xf32>
    %215 = arith.addf %213, %214 : vector<16x32xf32>
    %216 = arith.addf %135, %215 : vector<16x32xf32>
    %cst_69 = arith.constant dense<0.000000e+00> : vector<16xf32>
    %217 = vector.multi_reduction <add>, %216, %cst_69 [1] : vector<16x32xf32> to vector<16xf32>
    %218 = vector.shape_cast %217 : vector<16xf32> to vector<16x1xf32>
    %cst_70 = arith.constant 3.200000e+01 : f32
    %219 = vector.broadcast %cst_70 : f32 to vector<16x1xf32>
    %220 = arith.divf %218, %219 : vector<16x1xf32>
    %221 = vector.broadcast %220 : vector<16x1xf32> to vector<16x32xf32>
    %222 = arith.subf %216, %221 : vector<16x32xf32>
    %223 = arith.mulf %222, %222 : vector<16x32xf32>
    %cst_71 = arith.constant dense<0.000000e+00> : vector<16xf32>
    %224 = vector.multi_reduction <add>, %223, %cst_71 [1] : vector<16x32xf32> to vector<16xf32>
    %225 = vector.shape_cast %224 : vector<16xf32> to vector<16x1xf32>
    %cst_72 = arith.constant 3.200000e+01 : f32
    %226 = vector.broadcast %cst_72 : f32 to vector<16x1xf32>
    %227 = arith.divf %225, %226 : vector<16x1xf32>
    %228 = vector.broadcast %220 : vector<16x1xf32> to vector<16x32xf32>
    %229 = arith.subf %216, %228 : vector<16x32xf32>
    %cst_73 = arith.constant 9.99999974E-6 : f32
    %230 = vector.broadcast %cst_73 : f32 to vector<16x1xf32>
    %231 = arith.addf %227, %230 : vector<16x1xf32>
    %232 = math.rsqrt %231 : vector<16x1xf32>
    %233 = vector.broadcast %232 : vector<16x1xf32> to vector<16x32xf32>
    %234 = arith.mulf %229, %233 : vector<16x32xf32>
    %235 = vector.broadcast %139 : vector<1x32xf32> to vector<16x32xf32>
    %236 = arith.mulf %234, %235 : vector<16x32xf32>
    %237 = vector.broadcast %140 : vector<1x32xf32> to vector<16x32xf32>
    %238 = arith.addf %236, %237 : vector<16x32xf32>
    %239 = arith.truncf %238 : vector<16x32xf32> to vector<16x32xbf16>
    %cst_74 = arith.constant dense<0.000000e+00> : vector<16x32xf32>
    %240 = tpu.matmul %239, %145, %cst_74 {dimension_numbers = #tpu.dot_dimension_numbers<[1], [0], [0], [1], [0, 0, 1, 1], [], []>} : vector<16x32xbf16>, vector<32x32xbf16>, vector<16x32xf32> -> vector<16x32xf32>
    %241 = vector.broadcast %141 : vector<1x32xf32> to vector<16x32xf32>
    %242 = arith.addf %240, %241 : vector<16x32xf32>
    %cst_75 = arith.constant 0.000000e+00 : f32
    %243 = vector.broadcast %cst_75 : f32 to vector<16x32xf32>
    %244 = arith.maximumf %242, %243 : vector<16x32xf32>
    %245 = arith.truncf %244 : vector<16x32xf32> to vector<16x32xbf16>
    %cst_76 = arith.constant dense<0.000000e+00> : vector<16x32xf32>
    %246 = tpu.matmul %245, %146, %cst_76 {dimension_numbers = #tpu.dot_dimension_numbers<[1], [0], [0], [1], [0, 0, 1, 1], [], []>} : vector<16x32xbf16>, vector<32x32xbf16>, vector<16x32xf32> -> vector<16x32xf32>
    %247 = vector.broadcast %142 : vector<1x32xf32> to vector<16x32xf32>
    %248 = arith.addf %246, %247 : vector<16x32xf32>
    %249 = arith.addf %216, %248 : vector<16x32xf32>
    %c96_77 = arith.constant 96 : index
    %c0_78 = arith.constant 0 : index
    %250 = vector.load %arg1[%c96_77, %c0_78] : memref<104x128xf32, #tpu.memory_space<vmem>>, vector<1x32xf32>
    %c97 = arith.constant 97 : index
    %c0_79 = arith.constant 0 : index
    %251 = vector.load %arg1[%c97, %c0_79] : memref<104x128xf32, #tpu.memory_space<vmem>>, vector<1x32xf32>
    %c98 = arith.constant 98 : index
    %c0_80 = arith.constant 0 : index
    %252 = vector.load %arg1[%c98, %c0_80] : memref<104x128xf32, #tpu.memory_space<vmem>>, vector<1x128xf32>
    %c256 = arith.constant 256 : index
    %c0_81 = arith.constant 0 : index
    %253 = vector.load %arg2[%c256, %c0_81] : memref<288x128xbf16, #tpu.memory_space<vmem>>, vector<32x128xbf16>
    %cst_82 = arith.constant dense<0.000000e+00> : vector<16xf32>
    %254 = vector.multi_reduction <add>, %249, %cst_82 [1] : vector<16x32xf32> to vector<16xf32>
    %255 = vector.shape_cast %254 : vector<16xf32> to vector<16x1xf32>
    %cst_83 = arith.constant 3.200000e+01 : f32
    %256 = vector.broadcast %cst_83 : f32 to vector<16x1xf32>
    %257 = arith.divf %255, %256 : vector<16x1xf32>
    %258 = vector.broadcast %257 : vector<16x1xf32> to vector<16x32xf32>
    %259 = arith.subf %249, %258 : vector<16x32xf32>
    %260 = arith.mulf %259, %259 : vector<16x32xf32>
    %cst_84 = arith.constant dense<0.000000e+00> : vector<16xf32>
    %261 = vector.multi_reduction <add>, %260, %cst_84 [1] : vector<16x32xf32> to vector<16xf32>
    %262 = vector.shape_cast %261 : vector<16xf32> to vector<16x1xf32>
    %cst_85 = arith.constant 3.200000e+01 : f32
    %263 = vector.broadcast %cst_85 : f32 to vector<16x1xf32>
    %264 = arith.divf %262, %263 : vector<16x1xf32>
    %265 = vector.broadcast %257 : vector<16x1xf32> to vector<16x32xf32>
    %266 = arith.subf %249, %265 : vector<16x32xf32>
    %cst_86 = arith.constant 9.99999974E-6 : f32
    %267 = vector.broadcast %cst_86 : f32 to vector<16x1xf32>
    %268 = arith.addf %264, %267 : vector<16x1xf32>
    %269 = math.rsqrt %268 : vector<16x1xf32>
    %270 = vector.broadcast %269 : vector<16x1xf32> to vector<16x32xf32>
    %271 = arith.mulf %266, %270 : vector<16x32xf32>
    %272 = vector.broadcast %250 : vector<1x32xf32> to vector<16x32xf32>
    %273 = arith.mulf %271, %272 : vector<16x32xf32>
    %274 = vector.broadcast %251 : vector<1x32xf32> to vector<16x32xf32>
    %275 = arith.addf %273, %274 : vector<16x32xf32>
    %276 = arith.truncf %275 : vector<16x32xf32> to vector<16x32xbf16>
    %cst_87 = arith.constant dense<0.000000e+00> : vector<16x128xf32>
    %277 = tpu.matmul %276, %253, %cst_87 {dimension_numbers = #tpu.dot_dimension_numbers<[1], [0], [0], [1], [0, 0, 1, 1], [], []>} : vector<16x32xbf16>, vector<32x128xbf16>, vector<16x128xf32> -> vector<16x128xf32>
    %278 = vector.broadcast %252 : vector<1x128xf32> to vector<16x128xf32>
    %279 = arith.addf %277, %278 : vector<16x128xf32>
    %c0_88 = arith.constant 0 : index
    %c0_89 = arith.constant 0 : index
    %280 = vector.load %arg3[%c0_88, %c0_89] : memref<16x128xf32, #tpu.memory_space<vmem>>, vector<16x128xf32>
    tpu.vector_store %arg3[%c0_88, %c0_89], %279 {strides = array<i32>} : memref<16x128xf32, #tpu.memory_space<vmem>>, vector<16x128xf32>,
    return
  }
}

</mosaic_0001>

<bundles_post_ra>
// kernel: language_model_forward.1
= control target key start
LH: loop header
LB: loop body
LE: loop exit
PB: predicated region body
PF: predicated region fallthrough
CT: control target
= control target key end

     0   :  { %8 = vsyncpa [#allocation3], 0  ;;  %s2220_s0 = inlined_call_operand.vmem [shape: s32[16,1], index: 0, kind: input, shape index: {}]   ;;  %s2221_s1 = inlined_call_operand.hbm [shape: f32[104,128], index: 1, kind: input, shape index: {}]   ;;  %s2222_s2 = inlined_call_operand.hbm [shape: bf16[288,128], index: 2, kind: input, shape index: {}]   ;;  %s2223_s3 = inlined_call_operand.hbm [shape: f32[16,128], index: 3, kind: output, shape index: {}]  }
   0x1   :  { %9 = vsyncpa [#allocation6], 0 }
   0x2   :  { %10 = vsyncpa [#allocation4], 0  ;;  %s1922_s12 = smov [#allocation2]   ;;  %s1850_s16 = scalar_lea.hbm %s2221_s1, 1664 }
   0x3   :  { %s18_s13 = sshll.u32 %s1922_s12, 4  ;;  %p1851_p0 = scmp.ne.s32.totalorder %s2221_s1, %s1850_s16  ;;  %s19_s13 = int_to_ptr.vmem [resolvable:$true] %s18_s13 }
   0x4   :  { %p1854_p1 = scmp.lt.u32.totalorder %s1850_s16, %s2221_s1 }
   0x6   :  { %p1856_p2 = pnand %p1854_p1, %p1851_p0 }
   0x8   :  { %1859 = shalt.err (!%p1856_p2)
}
   0x9   :  { %s1860_s21 = scalar_lea.vmem %s19_s13, 1664  ;;  %p1865_p4 = scmp.lt.s32.totalorder %s19_s13, %s19_s13 }
   0xa   :  { %p1861_p3 = scmp.ne.s32.totalorder %s19_s13, %s1860_s21  ;;  %p1866_p5 = scmp.lt.s32.totalorder %s1860_s21, %s1860_s21 }
   0xc   :  { %p1867_p6 = por %p1866_p5, %p1865_p4 }
   0xe   :  { %p1868_p7 = pnand %p1867_p6, %p1861_p3 }
  0x10   :  { %1871 = shalt.err (!%p1868_p7)
}
  0x11   :  { %s1923_s22 = smov 128   ;;  %s1924_s23 = smov 8  }
  0x12   :  { %24 = dma.hbm_to_vmem [thread:$0]  %s2221_s1, 1664, %s19_s13, [#allocation3], %s1923_s22, %s1923_s22, %s1924_s23  }
  0x13   :  { %s1925_s26 = smov [#allocation5]   ;;  %s1872_s30 = scalar_lea.hbm %s2222_s2, 2304 }
  0x14   :  { %s30_s27 = sshll.u32 %s1925_s26, 4  ;;  %p1873_p8 = scmp.ne.s32.totalorder %s2222_s2, %s1872_s30  ;;  %s31_s27 = int_to_ptr.vmem [resolvable:$true] %s30_s27 }
  0x15   :  { %p1876_p9 = scmp.lt.u32.totalorder %s1872_s30, %s2222_s2 }
  0x17   :  { %p1878_p10 = pnand %p1876_p9, %p1873_p8 }
  0x19   :  { %1881 = shalt.err (!%p1878_p10)
}
  0x1a   :  { %s1882_s8 = scalar_lea.vmem %s31_s27, 2304  ;;  %p1887_p12 = scmp.lt.s32.totalorder %s31_s27, %s31_s27 }
  0x1b   :  { %p1883_p11 = scmp.ne.s32.totalorder %s31_s27, %s1882_s8  ;;  %p1888_p13 = scmp.lt.s32.totalorder %s1882_s8, %s1882_s8 }
  0x1d   :  { %p1889_p0 = por %p1888_p13, %p1887_p12 }
  0x1f   :  { %p1890_p1 = pnand %p1889_p0, %p1883_p11 }
  0x21   :  { %1893 = shalt.err (!%p1890_p1)
}
  0x22   :  { %s1926_s1 = smov 64   ;;  %s1927_s9 = smov 4  }
  0x23   :  { %36 = dma.hbm_to_vmem [thread:$0]  %s2222_s2, 2304, %s31_s27, [#allocation6], %s1926_s1, %s1926_s1, %s1927_s9  }
  0x24   :  { %1916 = dma.done.wait [#allocation3], 1664  }
  0x25   :  { %1917 = vsyncadd [#allocation3], 4294965632 }
  0x26   :  { %1918 = dma.done.wait [#allocation6], 2304  }
  0x27   :  { %1919 = vsyncadd [#allocation6], 4294964992  ;;  %v1928_v0 = vmov 0   ;;  %v44_v1 = vld [vmem:[%s2220_s0] sm:$0xff]  ;;  %v61_v3 = vld [vmem:[#allocation2 + $0x8] sm:$0xff]  ;;  %v1929_v10 = vmov 0.0   ;;  %v46_v16 = vlaneseq }
  0x28   :  { %1769 = vset.pattern.permute.xlu0 %v1928_v0  ;;  %v60_v2 = vld [vmem:[#allocation2] sm:$0xff]  ;;  %v62_v4 = vld [vmem:[#allocation2 + $0x10] sm:$0xff]  ;;  %v63_v5 = vld [vmem:[#allocation2 + $0x18] sm:$0xff]  ;;  %1617 = vmatprep.subr.bf16.mxu1 %v1929_v10  ;;  %vm70_vm0 = vcmask 523264   ;;  %vm189_vm3 = vcmask 261120   ;;  %vm1930_vm4 = vmmov 0  }
  0x29   :  { %49 = vperm.xlu0 %1769, %v44_v1   ;;  %v45_v6 = vld [vmem:[%s2220_s0 + $0x8] sm:$0xff]  ;;  %v1737_v7 = vpack.c.bf16 %v61_v3, %v60_v2  ;;  %v1741_v8 = vpack.c.bf16 %v63_v5, %v62_v4  ;;  %v64_v9 = vld [vmem:[#allocation2 + $0x20] sm:$0xff]  ;;  %v66_v12 = vld [vmem:[#allocation2 + $0x30] sm:$0xff]  ;;  %v1996_v17 = vand.u32 127, %v46_v16  ;;  %1621 = vmatprep.mubr.msk.bf16.mxu1 %vm1930_vm4, %v1929_v10  ;;  %s1931_s0 = smov 96   ;;  %s1932_s2 = smov 80  }
  0x2a   :  { %v65_v11 = vld [vmem:[#allocation2 + $0x28] sm:$0xff]  ;;  %v67_v14 = vld [vmem:[#allocation2 + $0x38] sm:$0xff]  ;;  %v68_v22 = vld [vmem:[#allocation2 + $0x40] sm:$0xff]  ;;  %s1933_s16 = smov 112   ;;  %vm290_vm5 = vcmask 130048   ;;  %v153_v5 = vshrl.u32 %v46_v16, 7 }
  0x2b   :  { %1738 = vmatprep.subr.bf16.mxu0 %v1737_v7  ;;  %v1745_v13 = vpack.c.bf16 %v65_v11, %v64_v9  ;;  %v1749_v15 = vpack.c.bf16 %v67_v14, %v66_v12  ;;  %v69_v24 = vld [vmem:[#allocation2 + $0x48] sm:$0xff]  ;;  %v1781_v41 = vld [vmem:[#allocation5 + $0x8] sm:$0xff]   ;;  %v1934_v11 = vmov -1e+30   ;;  %s1935_s17 = smov 48   ;;  %s1936_s18 = smov 16  }
  0x2c   :  { %1740 = vmatpush3.bf16.msra.mxu0 %v1737_v7  ;;  %v1780_v40 = vld [vmem:[#allocation5] sm:$0xff]   ;;  %v1493_v50 = vld [vmem:[#allocation2 + $0x50] ss:$0 sm:$0xff]  ;;  %v1494_v54 = vld [vmem:[#allocation2 + $0x51] ss:$0 sm:$0xff]  ;;  %v155_v7 = vshrl.u32 %v153_v5, 3  ;;  %vm160_vm7 = vcmp.le.s32.totalorder %v1996_v17, %v153_v5 }
  0x2d   :  { %52 = vperm.xlu0 %1769, %v45_v6   ;;  %1742 = vmatprep.subr.bf16.mxu0 %v1741_v8  ;;  %v154_v6 = vadd.s32 8, %v153_v5  ;;  %s1937_s19 = smov [#allocation7]  }
  0x2e   :  { %1618 = vmatpush3.bf16.msra.mxu1 %v1780_v40  ;;  %s1476_s20 = sshll.u32 %s1937_s19, 4  ;;  %s1477_s20 = int_to_ptr.vmem [resolvable:$true] %s1476_s20 }
  0x2f   :  { %1619 = vmatprep.subr.bf16.mxu1 %v1929_v10  ;;  %v156_v9 = vshrl.u32 %v154_v6, 3  ;;  %vm161_vm9 = vcmp.le.s32.totalorder %v1996_v17, %v154_v6  ;;  %v1783_v6 = vld [vmem:[#allocation5 + $0x18] sm:$0xff]   ;;  %s1894_s21 = scalar_lea.vmem %s1477_s20, 256  ;;  %p1899_p3 = scmp.lt.s32.totalorder %s1477_s20, %s1477_s20 }
  0x30   :  { %1744 = vmatpush3.bf16.msra.mxu0 %v1741_v8  ;;  %v157_v8 = vshrl.u32 %v1996_v17, 3  ;;  %p1895_p2 = scmp.ne.s32.totalorder %s1477_s20, %s1894_s21  ;;  %p1900_p4 = scmp.lt.s32.totalorder %s1894_s21, %s1894_s21 }
  0x31   :  { %1746 = vmatprep.subr.bf16.mxu0 %v1745_v13 }
  0x32   :  { %1620 = vmatpush3.bf16.msra.mxu1 %v1781_v41  ;;  %vm158_vm6 = vcmp.eq.s32.totalorder %v155_v7, %v157_v8  ;;  %vm159_vm8 = vcmp.eq.s32.totalorder %v156_v9, %v157_v8  ;;  %p1901_p5 = por %p1900_p4, %p1899_p3 }
  0x33   :  { %1625 = vmatprep.subr.bf16.mxu1 %v1929_v10  ;;  %vm162_vm10 = vmand %vm160_vm7, %vm158_vm6 }
  0x34   :  { %1748 = vmatpush3.bf16.msra.mxu0 %v1745_v13  ;;  %vm163_vm11 = vmand %vm161_vm9, %vm159_vm8  ;;  %v2046_v12 = vsel %vm162_vm10, 0.0, %v1934_v11  ;;  %p1902_p6 = pnand %p1901_p5, %p1895_p2 }
  0x35   :  { %1750 = vmatprep.subr.bf16.mxu0 %v1749_v15  ;;  %v2048_v14 = vsel %vm163_vm11, 0.0, %v1934_v11 }
  0x38   :  { %1752 = vmatpush3.bf16.msra.mxu0 %v1749_v15 }
  0x39   :  { %1631 = vmatprep.subr.bf16.mxu0 %v1929_v10 }
  0xa8   :  { %v50_v18 = vpop.permute.xlu0 %49 }
  0xa9   :  { %vm54_vm1 = vcmp.eq.s32.totalorder %v1996_v17, %v50_v18 }
  0xaa   :  { %v1489_v19 = vsel %vm54_vm1, 1.0, %v1929_v10 }
  0xab   :  { %1614 = vmatprep.mubr.msk.f32.mxu0 %vm70_vm0, %v1489_v19 }
  0xac   :  { %v53_v20 = vpop.permute.xlu0 %52 }
  0xad   :  { %vm55_vm2 = vcmp.eq.s32.totalorder %v1996_v17, %v53_v20 }
  0xae   :  { %v1490_v21 = vsel %vm55_vm2, 1.0, %v1929_v10 }
  0xaf   :  { %1615 = vmatmul.mubr.msk.f32.vlgmr.msra.gmra.mrb[0].mxu0 %vm70_vm0, %v1490_v21 }
  0xb0   :  { %1633 = vmatprep.mubr.msk.bf16.mxu0 %vm1930_vm4, %v1929_v10 }
 0x182   :  { %v1616_v23 = vpop.f32.mrb[0].mxu0 }
 0x183   :  { %v143_v25 = vpop.f32.mrb[1].mxu0  ;;  %v2004_v27 = vadd.f32 %v1616_v23, %v69_v24 }
 0x184   :  { %v2002_v26 = vadd.f32 %v143_v25, %v68_v22 }
 0x185   :  { %v193_v29 = vsel %vm189_vm3, %v2004_v27, 0.0 }
 0x186   :  { %v190_v28 = vsel %vm189_vm3, %v2002_v26, 0.0 }
 0x187   :  { %191 = vadd.xlane.f32.xlu1 %v190_v28 }
 0x18b   :  { %194 = vadd.xlane.f32.xlu1 %v193_v29 }
 0x214   :  { %v192_v30 = vpop.xlane.xlu1 %191 }
 0x215   :  { %v197_v31 = vmul.f32 0.03125, %v192_v30 }
 0x217   :  { %v199_v32 = vsub.f32 %v2002_v26, %v197_v31 }
 0x218   :  { %v195_v33 = vpop.xlane.xlu1 %194 }
 0x219   :  { %v198_v34 = vmul.f32 0.03125, %v195_v33  ;;  %v201_v35 = vmul.f32 %v199_v32, %v199_v32 }
 0x21b   :  { %v200_v36 = vsub.f32 %v2004_v27, %v198_v34  ;;  %v203_v37 = vsel %vm189_vm3, %v201_v35, 0.0 }
 0x21c   :  { %204 = vadd.xlane.f32.xlu0 %v203_v37 }
 0x21d   :  { %v202_v38 = vmul.f32 %v200_v36, %v200_v36 }
 0x21f   :  { %v206_v39 = vsel %vm189_vm3, %v202_v38, 0.0 }
 0x220   :  { %207 = vadd.xlane.f32.xlu1 %v206_v39 }
 0x2a9   :  { %v205_v42 = vpop.xlane.xlu0 %204 }
 0x2aa   :  { %v209_v43 = vmul.f32 0.03125, %v205_v42 }
 0x2ac   :  { %v211_v44 = vadd.f32 1e-05, %v209_v43 }
 0x2ad   :  { %v208_v45 = vpop.xlane.xlu1 %207 }
 0x2ae   :  { %1798 = vrsqrt.f32 %v211_v44  ;;  %v210_v46 = vmul.f32 0.03125, %v208_v45 }
 0x2b0   :  { %v212_v47 = vadd.f32 1e-05, %v210_v46 }
 0x2b2   :  { %1800 = vrsqrt.f32 %v212_v47 }
 0x2b8   :  { %v1799_v48 = vpop.eup %1798 }
 0x2b9   :  { %v215_v49 = vmul.f32 %v1799_v48, %v199_v32 }
 0x2bb   :  { %v221_v53 = vmul.f32 %v1493_v50, %v215_v49 }
 0x2bc   :  { %v1801_v51 = vpop.eup %1800 }
 0x2bd   :  { %v216_v52 = vmul.f32 %v1801_v51, %v200_v36  ;;  %v227_v56 = vadd.f32 %v1494_v54, %v221_v53 }
 0x2bf   :  { %v222_v55 = vmul.f32 %v1493_v50, %v216_v52 }
 0x2c1   :  { %v228_v57 = vadd.f32 %v1494_v54, %v222_v55 }
 0x2c3   :  { %v229_v58 = vpack.c.bf16 %v228_v57, %v227_v56 }
 0x2c5   :  { %1622 = vmatmul.mubr.msk.bf16.vlgmr.msra.gmra.mrb[0].mxu1 %vm189_vm3, %v229_v58 }
 0x2c6   :  { %1627 = vmatprep.mubr.msk.bf16.mxu1 %vm1930_vm4, %v1929_v10 }
 0x398   :  { %v279_v59 = vpop.f32.mrb[0].mxu1 }
 0x399   :  { %v1623_v60 = vpop.f32.mrb[1].mxu1 }
 0x39a   :  { %v282_v61 = vpop.f32.mrb[2].mxu1 }
 0x39b   :  { %v2023_v62 = vpack.c.bf16 %v282_v61, %v279_v59  ;;  %v1624_v63 = vpop.f32.mrb[3].mxu1 }
 0x39d   :  { %288 = vrot.lane.b32.xlu1 %v2023_v62, %s1931_s0 }
 0x3a1   :  { %410 = vrot.lane.b32.xlu1 %v2023_v62, %s1932_s2 }
 0x3a5   :  { %408 = vrot.lane.b32.xlu1 %v2023_v62, %s1933_s16 }
 0x40f   :  { %v289_v0 = vpop.permute.xlu1 %288 }
 0x410   :  { %v295_v1 = vsel %vm290_vm5, %v289_v0, 0 }
 0x411   :  { %1626 = vmatpush3.bf16.xpose.msra.mxu1 %v295_v1 }
 0x412   :  { %1637 = vmatprep.subr.bf16.mxu1 %v1929_v10 }
 0x413   :  { %v411_v2 = vpop.permute.xlu1 %410 }
 0x414   :  { %v416_v3 = vsel %vm290_vm5, %v411_v2, 0 }
 0x417   :  { %v409_v4 = vpop.permute.xlu1 %408 }
 0x418   :  { %1628 = vmatmul.mubr.msk.bf16.vlgmr.msra.gmra.mrb[4].mxu1 %vm290_vm5, %v2023_v62 }
 0x419   :  { %1638 = vmatpush3.bf16.xpose.msra.mxu1 %v416_v3  ;;  %1639 = vmatprep.mubr.msk.bf16.mxu1 %vm1930_vm4, %v1929_v10 }
 0x41a   :  { %1649 = vmatprep.subr.bf16.mxu1 %v1929_v10 }
 0x420   :  { %1640 = vmatmul.mubr.msk.bf16.vlgmr.msra.gmra.mrb[8].mxu1 %vm290_vm5, %v409_v4  ;;  %v1782_v4 = vld [vmem:[#allocation5 + $0x10] sm:$0xff]  }
 0x421   :  { %1653 = vmatprep.mubr.msk.bf16.mxu1 %vm1930_vm4, %v1929_v10  ;;  %1650 = vmatpush3.bf16.msra.mxu1 %v1782_v4 }
 0x422   :  { %1651 = vmatprep.subr.bf16.mxu1 %v1929_v10 }
 0x425   :  { %1652 = vmatpush3.bf16.msra.mxu1 %v1783_v6 }
 0x426   :  { %1665 = vmatprep.subr.bf16.mxu1 %v1929_v10 }
 0x4eb   :  { %v331_v13 = vpop.f32.mrb[4].mxu1 }
 0x4ec   :  { %v332_v15 = vadd.f32 %v331_v13, %v2046_v12  ;;  %v1629_v16 = vpop.f32.mrb[5].mxu1 }
 0x4ed   :  { %v334_v18 = vpop.f32.mrb[6].mxu1 }
 0x4ee   :  { %v335_v19 = vadd.f32 %v334_v18, %v2048_v14  ;;  %v1630_v20 = vpop.f32.mrb[7].mxu1  ;;  %v338_v21 = vsel %vm290_vm5, %v332_v15, -inf }
 0x4ef   :  { %339 = vmax.xlane.f32.xlu1 %v338_v21 }
 0x4f0   :  { %v341_v17 = vsel %vm290_vm5, %v335_v19, -inf }
 0x4f1   :  { %342 = vmax.xlane.f32.xlu0 %v341_v17 }
 0x4f3   :  { %v452_v22 = vpop.f32.mrb[8].mxu1 }
 0x4f4   :  { %v453_v23 = vadd.f32 %v452_v22, %v2046_v12  ;;  %v1641_v24 = vpop.f32.mrb[9].mxu1 }
 0x4f5   :  { %v455_v25 = vpop.f32.mrb[10].mxu1  ;;  %v1502_v24 = vld [vmem:[#allocation2 + $0x52] ss:$0 sm:$0xff] }
 0x4f6   :  { %v456_v28 = vadd.f32 %v455_v25, %v2048_v14  ;;  %v1642_v29 = vpop.f32.mrb[11].mxu1  ;;  %v459_v30 = vsel %vm290_vm5, %v453_v23, -inf }
 0x4f7   :  { %460 = vmax.xlane.f32.xlu0 %v459_v30 }
 0x4f8   :  { %v462_v31 = vsel %vm290_vm5, %v456_v28, -inf }
 0x4fb   :  { %463 = vmax.xlane.f32.xlu0 %v462_v31 }
 0x500   :  { %482 = vrot.lane.b32.xlu1 %v2023_v62, %s1935_s17 }
 0x57c   :  { %v340_v32 = vpop.xlane.xlu1 %339 }
 0x57d   :  { %v344_v33 = vsub.f32 %v332_v15, %v340_v32 }
 0x57e   :  { %v343_v34 = vpop.xlane.xlu0 %342 }
 0x57f   :  { %v346_v35 = vmul.f32 1.442695, %v344_v33  ;;  %v345_v36 = vsub.f32 %v335_v19, %v343_v34 }
 0x580   :  { %v483_v63 = vpop.permute.xlu1 %482 }
 0x581   :  { %1802 = vpow2.f32 %v346_v35  ;;  %v348_v37 = vmul.f32 1.442695, %v345_v36 }
 0x583   :  { %1804 = vpow2.f32 %v348_v37 }
 0x584   :  { %v461_v38 = vpop.xlane.xlu0 %460 }
 0x585   :  { %v465_v39 = vsub.f32 %v453_v23, %v461_v38 }
 0x587   :  { %v467_v40 = vmul.f32 1.442695, %v465_v39 }
 0x588   :  { %v464_v41 = vpop.xlane.xlu0 %463 }
 0x589   :  { %1806 = vpow2.f32 %v467_v40  ;;  %v466_v42 = vsub.f32 %v456_v28, %v464_v41 }
 0x58b   :  { %v1803_v43 = vpop.eup %1802  ;;  %v469_v44 = vmul.f32 1.442695, %v466_v42 }
 0x58c   :  { %v350_v45 = vsel %vm290_vm5, %v1803_v43, 0.0 }
 0x58d   :  { %v1805_v46 = vpop.eup %1804  ;;  %1808 = vpow2.f32 %v469_v44  ;;  %351 = vadd.xlane.f32.xlu0 %v350_v45  ;;  %v1784_v45 = vld [vmem:[#allocation5 + $0x20] sm:$0xff]  }
 0x58e   :  { %v353_v47 = vsel %vm290_vm5, %v1805_v46, 0.0 }
 0x591   :  { %354 = vadd.xlane.f32.xlu0 %v353_v47 }
 0x593   :  { %v1807_v48 = vpop.eup %1806 }
 0x594   :  { %v471_v49 = vsel %vm290_vm5, %v1807_v48, 0.0 }
 0x595   :  { %472 = vadd.xlane.f32.xlu0 %v471_v49 }
 0x597   :  { %v1809_v50 = vpop.eup %1808 }
 0x598   :  { %v474_v51 = vsel %vm290_vm5, %v1809_v50, 0.0 }
 0x599   :  { %475 = vadd.xlane.f32.xlu0 %v474_v51 }
 0x5af   :  { %361 = vrot.lane.b32.xlu0 %v2023_v62, %s1926_s1 }
 0x61a   :  { %v352_v52 = vpop.xlane.xlu0 %351 }
 0x61b   :  { %1810 = vrcp.f32 %v352_v52 }
 0x61e   :  { %v355_v53 = vpop.xlane.xlu0 %354 }
 0x61f   :  { %1812 = vrcp.f32 %v355_v53 }
 0x622   :  { %v473_v54 = vpop.xlane.xlu0 %472 }
 0x623   :  { %1814 = vrcp.f32 %v473_v54  ;;  %v1506_v54 = vld [vmem:[#allocation2 + $0x53] ss:$0 sm:$0xff] }
 0x625   :  { %v1811_v56 = vpop.eup %1810 }
 0x626   :  { %v476_v55 = vpop.xlane.xlu0 %475  ;;  %v358_v58 = vmul.f32 %v1811_v56, %v1803_v43 }
 0x627   :  { %1816 = vrcp.f32 %v476_v55 }
 0x629   :  { %v1813_v57 = vpop.eup %1812 }
 0x62a   :  { %v359_v59 = vmul.f32 %v1813_v57, %v1805_v46  ;;  %v362_v60 = vpop.permute.xlu0 %361  ;;  %v1785_v46 = vld [vmem:[#allocation5 + $0x28] sm:$0xff]  }
 0x62b   :  { %1632 = vmatpush3.bf16.msra.mxu0 %v362_v60 }
 0x62c   :  { %v360_v61 = vpack.c.bf16 %v359_v59, %v358_v58  ;;  %1643 = vmatprep.subr.bf16.mxu0 %v1929_v10  ;;  %v1507_v59 = vld [vmem:[#allocation2 + $0x54] ss:$0 sm:$0xff] }
 0x62d   :  { %v1815_v62 = vpop.eup %1814 }
 0x62e   :  { %1634 = vmatmul.mubr.msk.bf16.vlgmr.msra.gmra.mrb[4].mxu0 %vm290_vm5, %v360_v61  ;;  %v479_v1 = vmul.f32 %v1815_v62, %v1807_v48 }
 0x62f   :  { %1644 = vmatpush3.bf16.msra.mxu0 %v483_v63  ;;  %1645 = vmatprep.mubr.msk.bf16.mxu0 %vm1930_vm4, %v1929_v10 }
 0x630   :  { %1657 = vmatprep.subr.bf16.mxu0 %v1929_v10 }
 0x631   :  { %v1817_v0 = vpop.eup %1816 }
 0x632   :  { %v480_v2 = vmul.f32 %v1817_v0, %v1809_v50  ;;  %v1786_v0 = vld [vmem:[#allocation5 + $0x30] sm:$0xff]  }
 0x634   :  { %v481_v3 = vpack.c.bf16 %v480_v2, %v479_v1  ;;  %v1787_v1 = vld [vmem:[#allocation5 + $0x38] sm:$0xff]   ;;  %v1508_v2 = vld [vmem:[#allocation2 + $0x55] ss:$0 sm:$0xff] }
 0x636   :  { %1646 = vmatmul.mubr.msk.bf16.vlgmr.msra.gmra.mrb[8].mxu0 %vm290_vm5, %v481_v3 }
 0x637   :  { %1661 = vmatprep.mubr.msk.bf16.mxu0 %vm1930_vm4, %v1929_v10  ;;  %1658 = vmatpush3.bf16.msra.mxu0 %v1784_v45  ;;  %v1516_v45 = vld [vmem:[#allocation2 + $0x58] ss:$0 sm:$0xff] }
 0x638   :  { %1659 = vmatprep.subr.bf16.mxu0 %v1929_v10 }
 0x63b   :  { %1660 = vmatpush3.bf16.msra.mxu0 %v1785_v46 }
 0x63c   :  { %1673 = vmatprep.subr.bf16.mxu0 %v1929_v10 }
 0x701   :  { %v401_v5 = vpop.f32.mrb[4].mxu0 }
 0x702   :  { %v1635_v7 = vpop.f32.mrb[5].mxu0 }
 0x703   :  { %v404_v8 = vpop.f32.mrb[6].mxu0 }
 0x704   :  { %v1636_v9 = vpop.f32.mrb[7].mxu0 }
 0x709   :  { %v522_v11 = vpop.f32.mrb[8].mxu0 }
 0x70a   :  { %v1647_v13 = vpop.f32.mrb[9].mxu0 }
 0x70b   :  { %v525_v15 = vpop.f32.mrb[10].mxu0 }
 0x70c   :  { %v1770_v16 = vpack.i.bf16 %v525_v15, %v522_v11  ;;  %v1648_v18 = vpop.f32.mrb[11].mxu0  ;;  %v1512_v15 = vld [vmem:[#allocation2 + $0x56] ss:$0 sm:$0xff] }
 0x70e   :  { %1771 = vrot.lane.b32.xlu0 %v1770_v16, %s1936_s18 }
 0x780   :  { %v1772_v19 = vpop.permute.xlu0 %1771 }
 0x781   :  { %v1774_v20 = vunpack.i.h.bf16 %v1772_v19  ;;  %v1773_v21 = vunpack.i.l.bf16 %v1772_v19 }
 0x783   :  { %v538_v17 = vsel %vm290_vm5, %v404_v8, %v1774_v20  ;;  %v537_v22 = vsel %vm290_vm5, %v401_v5, %v1773_v21 }
 0x784   :  { %v539_v23 = vpack.c.bf16 %v538_v17, %v537_v22 }
 0x786   :  { %1654 = vmatmul.mubr.msk.bf16.vlgmr.msra.gmra.mrb[12].mxu1 %vm189_vm3, %v539_v23 }
 0x787   :  { %1669 = vmatprep.mubr.msk.bf16.mxu1 %vm1930_vm4, %v1929_v10  ;;  %1666 = vmatpush3.bf16.msra.mxu1 %v1786_v0 }
 0x788   :  { %1667 = vmatprep.subr.bf16.mxu1 %v1929_v10 }
 0x78b   :  { %1668 = vmatpush3.bf16.msra.mxu1 %v1787_v1 }
 0x78c   :  { %1681 = vmatprep.subr.bf16.mxu1 %v1929_v10 }
 0x859   :  { %v593_v25 = vpop.f32.mrb[12].mxu1 }
 0x85a   :  { %v594_v28 = vadd.f32 %v1502_v24, %v593_v25  ;;  %v1655_v29 = vpop.f32.mrb[13].mxu1 }
 0x85b   :  { %v596_v30 = vpop.f32.mrb[14].mxu1 }
 0x85c   :  { %v2083_v31 = vadd.f32 %v594_v28, %v2002_v26  ;;  %v597_v32 = vadd.f32 %v1502_v24, %v596_v30  ;;  %v1656_v33 = vpop.f32.mrb[15].mxu1 }
 0x85e   :  { %v2086_v34 = vadd.f32 %v597_v32, %v2004_v27  ;;  %v602_v35 = vsel %vm189_vm3, %v2083_v31, 0.0 }
 0x85f   :  { %603 = vadd.xlane.f32.xlu1 %v602_v35 }
 0x860   :  { %v605_v36 = vsel %vm189_vm3, %v2086_v34, 0.0 }
 0x861   :  { %606 = vadd.xlane.f32.xlu0 %v605_v36 }
 0x8ec   :  { %v604_v37 = vpop.xlane.xlu1 %603 }
 0x8ed   :  { %v608_v38 = vmul.f32 0.03125, %v604_v37 }
 0x8ee   :  { %v607_v39 = vpop.xlane.xlu0 %606 }
 0x8ef   :  { %v610_v40 = vsub.f32 %v2083_v31, %v608_v38  ;;  %v609_v26 = vmul.f32 0.03125, %v607_v39  ;;  %v1788_v38 = vld [vmem:[#allocation5 + $0x40] sm:$0xff]   ;;  %v1789_v39 = vld [vmem:[#allocation5 + $0x48] sm:$0xff]  }
 0x8f1   :  { %v611_v41 = vsub.f32 %v2086_v34, %v609_v26  ;;  %v612_v42 = vmul.f32 %v610_v40, %v610_v40 }
 0x8f3   :  { %v614_v27 = vsel %vm189_vm3, %v612_v42, 0.0  ;;  %v613_v43 = vmul.f32 %v611_v41, %v611_v41 }
 0x8f4   :  { %615 = vadd.xlane.f32.xlu0 %v614_v27 }
 0x8f5   :  { %v617_v44 = vsel %vm189_vm3, %v613_v43, 0.0 }
 0x8f6   :  { %618 = vadd.xlane.f32.xlu1 %v617_v44 }
 0x981   :  { %v616_v47 = vpop.xlane.xlu0 %615 }
 0x982   :  { %v620_v48 = vmul.f32 0.03125, %v616_v47 }
 0x983   :  { %v619_v49 = vpop.xlane.xlu1 %618 }
 0x984   :  { %v622_v50 = vadd.f32 1e-05, %v620_v48  ;;  %v621_v51 = vmul.f32 0.03125, %v619_v49 }
 0x986   :  { %1818 = vrsqrt.f32 %v622_v50  ;;  %v623_v52 = vadd.f32 1e-05, %v621_v51  ;;  %v1517_v50 = vld [vmem:[#allocation2 + $0x59] ss:$0 sm:$0xff] }
 0x988   :  { %1820 = vrsqrt.f32 %v623_v52 }
 0x990   :  { %v1819_v53 = vpop.eup %1818 }
 0x991   :  { %v626_v55 = vmul.f32 %v1819_v53, %v610_v40 }
 0x992   :  { %v1821_v56 = vpop.eup %1820 }
 0x993   :  { %v632_v57 = vmul.f32 %v1506_v54, %v626_v55  ;;  %v627_v58 = vmul.f32 %v1821_v56, %v611_v41 }
 0x995   :  { %v633_v60 = vmul.f32 %v1506_v54, %v627_v58  ;;  %v638_v61 = vadd.f32 %v1507_v59, %v632_v57 }
 0x997   :  { %v639_v63 = vadd.f32 %v1507_v59, %v633_v60 }
 0x999   :  { %v640_v62 = vpack.c.bf16 %v639_v63, %v638_v61 }
 0x99b   :  { %1662 = vmatmul.mubr.msk.bf16.vlgmr.msra.gmra.mrb[12].mxu0 %vm189_vm3, %v640_v62 }
 0x99c   :  { %1677 = vmatprep.mubr.msk.bf16.mxu0 %vm1930_vm4, %v1929_v10  ;;  %1674 = vmatpush3.bf16.msra.mxu0 %v1788_v38 }
 0x99d   :  { %1675 = vmatprep.subr.bf16.mxu0 %v1929_v10 }
 0x9a0   :  { %1676 = vmatpush3.bf16.msra.mxu0 %v1789_v39 }
 0x9a1   :  { %1687 = vmatprep.subr.bf16.mxu0 %v1929_v10 }
 0xa6e   :  { %v694_v3 = vpop.f32.mrb[12].mxu0 }
 0xa6f   :  { %v695_v4 = vadd.f32 %v1508_v2, %v694_v3  ;;  %v1663_v5 = vpop.f32.mrb[13].mxu0 }
 0xa70   :  { %v697_v6 = vpop.f32.mrb[14].mxu0 }
 0xa71   :  { %v698_v7 = vadd.f32 %v1508_v2, %v697_v6  ;;  %v1664_v8 = vpop.f32.mrb[15].mxu0  ;;  %v701_v9 = vmax.f32 %v695_v4, 0.0 }
 0xa73   :  { %v702_v11 = vmax.f32 %v698_v7, 0.0 }
 0xa75   :  { %v703_v13 = vpack.c.bf16 %v702_v11, %v701_v9 }
 0xa77   :  { %1670 = vmatmul.mubr.msk.bf16.vlgmr.msra.gmra.mrb[16].mxu1 %vm189_vm3, %v703_v13 }
 0xa78   :  { %1683 = vmatprep.mubr.msk.bf16.mxu1 %vm1930_vm4, %v1929_v10 }
 0xb4a   :  { %v757_v16 = vpop.f32.mrb[16].mxu1 }
 0xb4b   :  { %v758_v18 = vadd.f32 %v1512_v15, %v757_v16  ;;  %v1671_v19 = vpop.f32.mrb[17].mxu1 }
 0xb4c   :  { %v760_v20 = vpop.f32.mrb[18].mxu1 }
 0xb4d   :  { %v2107_v21 = vadd.f32 %v758_v18, %v2083_v31  ;;  %v761_v17 = vadd.f32 %v1512_v15, %v760_v20  ;;  %v1672_v22 = vpop.f32.mrb[19].mxu1 }
 0xb4f   :  { %v2110_v23 = vadd.f32 %v761_v17, %v2086_v34  ;;  %v789_v24 = vsel %vm189_vm3, %v2107_v21, 0.0 }
 0xb50   :  { %790 = vadd.xlane.f32.xlu0 %v789_v24 }
 0xb51   :  { %v792_v25 = vsel %vm189_vm3, %v2110_v23, 0.0 }
 0xb52   :  { %793 = vadd.xlane.f32.xlu1 %v792_v25 }
 0xbdd   :  { %v791_v28 = vpop.xlane.xlu0 %790 }
 0xbde   :  { %v795_v29 = vmul.f32 0.03125, %v791_v28 }
 0xbdf   :  { %v794_v30 = vpop.xlane.xlu1 %793 }
 0xbe0   :  { %v797_v32 = vsub.f32 %v2107_v21, %v795_v29  ;;  %v796_v31 = vmul.f32 0.03125, %v794_v30 }
 0xbe2   :  { %v798_v33 = vsub.f32 %v2110_v23, %v796_v31  ;;  %v799_v35 = vmul.f32 %v797_v32, %v797_v32 }
 0xbe4   :  { %v801_v34 = vsel %vm189_vm3, %v799_v35, 0.0  ;;  %v800_v36 = vmul.f32 %v798_v33, %v798_v33 }
 0xbe5   :  { %802 = vadd.xlane.f32.xlu0 %v801_v34 }
 0xbe6   :  { %v804_v37 = vsel %vm189_vm3, %v800_v36, 0.0 }
 0xbe7   :  { %805 = vadd.xlane.f32.xlu1 %v804_v37 }
 0xc72   :  { %v803_v40 = vpop.xlane.xlu0 %802 }
 0xc73   :  { %v807_v26 = vmul.f32 0.03125, %v803_v40 }
 0xc74   :  { %v806_v41 = vpop.xlane.xlu1 %805 }
 0xc75   :  { %v809_v42 = vadd.f32 1e-05, %v807_v26  ;;  %v808_v27 = vmul.f32 0.03125, %v806_v41 }
 0xc77   :  { %1822 = vrsqrt.f32 %v809_v42  ;;  %v810_v43 = vadd.f32 1e-05, %v808_v27 }
 0xc79   :  { %1824 = vrsqrt.f32 %v810_v43 }
 0xc81   :  { %v1823_v44 = vpop.eup %1822 }
 0xc82   :  { %v813_v46 = vmul.f32 %v1823_v44, %v797_v32 }
 0xc83   :  { %v1825_v47 = vpop.eup %1824 }
 0xc84   :  { %v819_v48 = vmul.f32 %v1516_v45, %v813_v46  ;;  %v814_v49 = vmul.f32 %v1825_v47, %v798_v33 }
 0xc86   :  { %v820_v51 = vmul.f32 %v1516_v45, %v814_v49  ;;  %v825_v52 = vadd.f32 %v1517_v50, %v819_v48 }
 0xc88   :  { %v826_v53 = vadd.f32 %v1517_v50, %v820_v51 }
 0xc8a   :  { %v827_v54 = vpack.c.bf16 %v826_v53, %v825_v52 }
 0xc8c   :  { %1678 = vmatmul.mubr.msk.bf16.vlgmr.msra.gmra.mrb[16].mxu0 %vm189_vm3, %v827_v54 }
 0xc8d   :  { %1689 = vmatprep.mubr.msk.bf16.mxu0 %vm1930_vm4, %v1929_v10 }
 0xd5f   :  { %v877_v55 = vpop.f32.mrb[16].mxu0 }
 0xd60   :  { %v1679_v56 = vpop.f32.mrb[17].mxu0 }
 0xd61   :  { %v880_v57 = vpop.f32.mrb[18].mxu0  ;;  %v1790_v56 = vld [vmem:[#allocation5 + $0x50] sm:$0xff]  }
 0xd62   :  { %v2125_v58 = vpack.c.bf16 %v880_v57, %v877_v55  ;;  %v1680_v59 = vpop.f32.mrb[19].mxu0 }
 0xd64   :  { %1007 = vrot.lane.b32.xlu1 %v2125_v58, %s1932_s2  ;;  %886 = vrot.lane.b32.xlu0 %v2125_v58, %s1931_s0 }
 0xd68   :  { %1005 = vrot.lane.b32.xlu1 %v2125_v58, %s1933_s16 }
 0xdd6   :  { %v887_v60 = vpop.permute.xlu0 %886  ;;  %v1008_v63 = vpop.permute.xlu1 %1007 }
 0xdd7   :  { %v892_v61 = vsel %vm290_vm5, %v887_v60, 0  ;;  %v1013_v62 = vsel %vm290_vm5, %v1008_v63, 0 }
 0xdd8   :  { %1682 = vmatpush3.bf16.xpose.msra.mxu1 %v892_v61  ;;  %v1791_v61 = vld [vmem:[#allocation5 + $0x58] sm:$0xff]  }
 0xdd9   :  { %1693 = vmatprep.subr.bf16.mxu1 %v1929_v10 }
 0xdda   :  { %v1006_v0 = vpop.permute.xlu1 %1005 }
 0xddf   :  { %1684 = vmatmul.mubr.msk.bf16.vlgmr.msra.gmra.mrb[20].mxu1 %vm290_vm5, %v2125_v58 }
 0xde0   :  { %1694 = vmatpush3.bf16.xpose.msra.mxu1 %v1013_v62  ;;  %1695 = vmatprep.mubr.msk.bf16.mxu1 %vm1930_vm4, %v1929_v10 }
 0xde1   :  { %1705 = vmatprep.subr.bf16.mxu1 %v1929_v10 }
 0xde7   :  { %1696 = vmatmul.mubr.msk.bf16.vlgmr.msra.gmra.mrb[24].mxu1 %vm290_vm5, %v1006_v0 }
 0xde8   :  { %1709 = vmatprep.mubr.msk.bf16.mxu1 %vm1930_vm4, %v1929_v10  ;;  %1706 = vmatpush3.bf16.msra.mxu1 %v1790_v56 }
 0xde9   :  { %1707 = vmatprep.subr.bf16.mxu1 %v1929_v10 }
 0xdec   :  { %1708 = vmatpush3.bf16.msra.mxu1 %v1791_v61 }
 0xded   :  { %1721 = vmatprep.subr.bf16.mxu1 %v1929_v10 }
 0xeb2   :  { %v928_v1 = vpop.f32.mrb[20].mxu1 }
 0xeb3   :  { %v929_v2 = vadd.f32 %v928_v1, %v2046_v12  ;;  %v1685_v3 = vpop.f32.mrb[21].mxu1 }
 0xeb4   :  { %v931_v4 = vpop.f32.mrb[22].mxu1 }
 0xeb5   :  { %v932_v5 = vadd.f32 %v931_v4, %v2048_v14  ;;  %v1686_v6 = vpop.f32.mrb[23].mxu1  ;;  %v935_v7 = vsel %vm290_vm5, %v929_v2, -inf }
 0xeb6   :  { %936 = vmax.xlane.f32.xlu0 %v935_v7 }
 0xeb7   :  { %v938_v8 = vsel %vm290_vm5, %v932_v5, -inf }
 0xeb8   :  { %939 = vmax.xlane.f32.xlu1 %v938_v8 }
 0xeba   :  { %v1049_v9 = vpop.f32.mrb[24].mxu1 }
 0xebb   :  { %v1050_v11 = vadd.f32 %v1049_v9, %v2046_v12  ;;  %v1697_v13 = vpop.f32.mrb[25].mxu1  ;;  %v1525_v9 = vld [vmem:[#allocation2 + $0x5a] ss:$0 sm:$0xff] }
 0xebc   :  { %v1052_v15 = vpop.f32.mrb[26].mxu1 }
 0xebd   :  { %v1053_v16 = vadd.f32 %v1052_v15, %v2048_v14  ;;  %v1698_v18 = vpop.f32.mrb[27].mxu1  ;;  %v1056_v19 = vsel %vm290_vm5, %v1050_v11, -inf }
 0xebe   :  { %1057 = vmax.xlane.f32.xlu0 %v1056_v19 }
 0xebf   :  { %v1059_v20 = vsel %vm290_vm5, %v1053_v16, -inf }
 0xec2   :  { %1060 = vmax.xlane.f32.xlu0 %v1059_v20 }
 0xf43   :  { %v937_v17 = vpop.xlane.xlu0 %936 }
 0xf44   :  { %v941_v22 = vsub.f32 %v929_v2, %v937_v17 }
 0xf45   :  { %v940_v24 = vpop.xlane.xlu1 %939 }
 0xf46   :  { %v943_v25 = vmul.f32 1.442695, %v941_v22  ;;  %v942_v28 = vsub.f32 %v932_v5, %v940_v24 }
 0xf48   :  { %1826 = vpow2.f32 %v943_v25  ;;  %v945_v29 = vmul.f32 1.442695, %v942_v28 }
 0xf4a   :  { %1828 = vpow2.f32 %v945_v29 }
 0xf4b   :  { %v1058_v12 = vpop.xlane.xlu0 %1057 }
 0xf4c   :  { %v1062_v30 = vsub.f32 %v1050_v11, %v1058_v12 }
 0xf4e   :  { %v1064_v32 = vmul.f32 1.442695, %v1062_v30 }
 0xf4f   :  { %v1061_v31 = vpop.xlane.xlu0 %1060 }
 0xf50   :  { %1830 = vpow2.f32 %v1064_v32  ;;  %v1063_v14 = vsub.f32 %v1053_v16, %v1061_v31 }
 0xf52   :  { %v1827_v33 = vpop.eup %1826  ;;  %v1066_v35 = vmul.f32 1.442695, %v1063_v14 }
 0xf53   :  { %v947_v34 = vsel %vm290_vm5, %v1827_v33, 0.0 }
 0xf54   :  { %v1829_v36 = vpop.eup %1828  ;;  %1832 = vpow2.f32 %v1066_v35  ;;  %948 = vadd.xlane.f32.xlu1 %v947_v34  ;;  %v1793_v35 = vld [vmem:[#allocation5 + $0x68] sm:$0xff]  }
 0xf55   :  { %v950_v37 = vsel %vm290_vm5, %v1829_v36, 0.0 }
 0xf56   :  { %951 = vadd.xlane.f32.xlu0 %v950_v37 }
 0xf5a   :  { %v1831_v38 = vpop.eup %1830 }
 0xf5b   :  { %v1068_v39 = vsel %vm290_vm5, %v1831_v38, 0.0 }
 0xf5c   :  { %1069 = vadd.xlane.f32.xlu1 %v1068_v39 }
 0xf5e   :  { %v1833_v40 = vpop.eup %1832 }
 0xf5f   :  { %v1071_v26 = vsel %vm290_vm5, %v1833_v40, 0.0 }
 0xf60   :  { %1072 = vadd.xlane.f32.xlu0 %v1071_v26 }
 0xf6d   :  { %958 = vrot.lane.b32.xlu1 %v2125_v58, %s1926_s1 }
 0xf76   :  { %1079 = vrot.lane.b32.xlu0 %v2125_v58, %s1935_s17 }
 0xfe1   :  { %v949_v41 = vpop.xlane.xlu1 %948 }
 0xfe2   :  { %1834 = vrcp.f32 %v949_v41  ;;  %v1529_v41 = vld [vmem:[#allocation2 + $0x5b] ss:$0 sm:$0xff] }
 0xfe3   :  { %v952_v42 = vpop.xlane.xlu0 %951 }
 0xfe4   :  { %1836 = vrcp.f32 %v952_v42 }
 0xfe9   :  { %v1070_v27 = vpop.xlane.xlu1 %1069 }
 0xfea   :  { %1838 = vrcp.f32 %v1070_v27 }
 0xfec   :  { %v1835_v43 = vpop.eup %1834 }
 0xfed   :  { %v959_v44 = vpop.permute.xlu1 %958  ;;  %v1073_v45 = vpop.xlane.xlu0 %1072  ;;  %v955_v47 = vmul.f32 %v1835_v43, %v1827_v33  ;;  %v1792_v33 = vld [vmem:[#allocation5 + $0x60] sm:$0xff]  }
 0xfee   :  { %v1837_v46 = vpop.eup %1836  ;;  %1840 = vrcp.f32 %v1073_v45  ;;  %1688 = vmatpush3.bf16.msra.mxu0 %v959_v44  ;;  %v1530_v45 = vld [vmem:[#allocation2 + $0x5c] ss:$0 sm:$0xff] }
 0xfef   :  { %v956_v48 = vmul.f32 %v1837_v46, %v1829_v36  ;;  %1699 = vmatprep.subr.bf16.mxu0 %v1929_v10 }
 0xff1   :  { %v1080_v49 = vpop.permute.xlu0 %1079  ;;  %v957_v50 = vpack.c.bf16 %v956_v48, %v955_v47 }
 0xff3   :  { %1690 = vmatmul.mubr.msk.bf16.vlgmr.msra.gmra.mrb[20].mxu0 %vm290_vm5, %v957_v50  ;;  %v1794_v50 = vld [vmem:[#allocation5 + $0x70] sm:$0xff]  }
 0xff4   :  { %1700 = vmatpush3.bf16.msra.mxu0 %v1080_v49  ;;  %1701 = vmatprep.mubr.msk.bf16.mxu0 %vm1930_vm4, %v1929_v10  ;;  %v1839_v51 = vpop.eup %1838 }
 0xff5   :  { %1713 = vmatprep.subr.bf16.mxu0 %v1929_v10  ;;  %v1076_v53 = vmul.f32 %v1839_v51, %v1831_v38  ;;  %v1795_v51 = vld [vmem:[#allocation5 + $0x78] sm:$0xff]  }
 0xff8   :  { %v1841_v52 = vpop.eup %1840 }
 0xff9   :  { %v1077_v54 = vmul.f32 %v1841_v52, %v1833_v40  ;;  %v1531_v52 = vld [vmem:[#allocation2 + $0x5d] ss:$0 sm:$0xff] }
 0xffb   :  { %v1078_v55 = vpack.c.bf16 %v1077_v54, %v1076_v53 }
 0xffd   :  { %1702 = vmatmul.mubr.msk.bf16.vlgmr.msra.gmra.mrb[24].mxu0 %vm290_vm5, %v1078_v55 }
 0xffe   :  { %1717 = vmatprep.mubr.msk.bf16.mxu0 %vm1930_vm4, %v1929_v10  ;;  %1714 = vmatpush3.bf16.msra.mxu0 %v1792_v33 }
 0xfff   :  { %1715 = vmatprep.subr.bf16.mxu0 %v1929_v10 }
0x1002   :  { %1716 = vmatpush3.bf16.msra.mxu0 %v1793_v35 }
0x1003   :  { %1729 = vmatprep.subr.bf16.mxu0 %v1929_v10 }
0x10c6   :  { %v998_v57 = vpop.f32.mrb[20].mxu0 }
0x10c7   :  { %v1691_v58 = vpop.f32.mrb[21].mxu0 }
0x10c8   :  { %v1001_v59 = vpop.f32.mrb[22].mxu0 }
0x10c9   :  { %v1692_v60 = vpop.f32.mrb[23].mxu0 }
0x10d0   :  { %v1119_v63 = vpop.f32.mrb[24].mxu0 }
0x10d1   :  { %v1703_v62 = vpop.f32.mrb[25].mxu0 }
0x10d2   :  { %v1122_v0 = vpop.f32.mrb[26].mxu0 }
0x10d3   :  { %v1775_v1 = vpack.i.bf16 %v1122_v0, %v1119_v63  ;;  %v1704_v2 = vpop.f32.mrb[27].mxu0  ;;  %v1535_v63 = vld [vmem:[#allocation2 + $0x5e] ss:$0 sm:$0xff] }
0x10d5   :  { %1776 = vrot.lane.b32.xlu1 %v1775_v1, %s1936_s18 }
0x1147   :  { %v1777_v3 = vpop.permute.xlu1 %1776 }
0x1148   :  { %v1779_v4 = vunpack.i.h.bf16 %v1777_v3  ;;  %v1778_v5 = vunpack.i.l.bf16 %v1777_v3 }
0x114a   :  { %v1135_v6 = vsel %vm290_vm5, %v1001_v59, %v1779_v4  ;;  %v1134_v7 = vsel %vm290_vm5, %v998_v57, %v1778_v5 }
0x114b   :  { %v1136_v8 = vpack.c.bf16 %v1135_v6, %v1134_v7 }
0x114d   :  { %1710 = vmatmul.mubr.msk.bf16.vlgmr.msra.gmra.mrb[28].mxu1 %vm189_vm3, %v1136_v8 }
0x114e   :  { %1725 = vmatprep.mubr.msk.bf16.mxu1 %vm1930_vm4, %v1929_v10  ;;  %1722 = vmatpush3.bf16.msra.mxu1 %v1794_v50 }
0x114f   :  { %1723 = vmatprep.subr.bf16.mxu1 %v1929_v10 }
0x1152   :  { %1724 = vmatpush3.bf16.msra.mxu1 %v1795_v51 }
0x1220   :  { %v1190_v11 = vpop.f32.mrb[28].mxu1 }
0x1221   :  { %v1191_v13 = vadd.f32 %v1525_v9, %v1190_v11  ;;  %v1711_v15 = vpop.f32.mrb[29].mxu1 }
0x1222   :  { %v1193_v16 = vpop.f32.mrb[30].mxu1 }
0x1223   :  { %v2177_v18 = vadd.f32 %v1191_v13, %v2107_v21  ;;  %v1194_v19 = vadd.f32 %v1525_v9, %v1193_v16  ;;  %v1712_v20 = vpop.f32.mrb[31].mxu1 }
0x1225   :  { %v2180_v17 = vadd.f32 %v1194_v19, %v2110_v23  ;;  %v1199_v22 = vsel %vm189_vm3, %v2177_v18, 0.0 }
0x1226   :  { %1200 = vadd.xlane.f32.xlu1 %v1199_v22 }
0x1227   :  { %v1202_v24 = vsel %vm189_vm3, %v2180_v17, 0.0 }
0x1228   :  { %1203 = vadd.xlane.f32.xlu0 %v1202_v24 }
0x12b3   :  { %v1201_v25 = vpop.xlane.xlu1 %1200 }
0x12b4   :  { %v1205_v28 = vmul.f32 0.03125, %v1201_v25  ;;  %v1796_v25 = vld [vmem:[#allocation5 + $0x80] sm:$0xff]  }
0x12b5   :  { %v1204_v29 = vpop.xlane.xlu0 %1203 }
0x12b6   :  { %v1207_v12 = vsub.f32 %v2177_v18, %v1205_v28  ;;  %v1206_v21 = vmul.f32 0.03125, %v1204_v29 }
0x12b8   :  { %v1208_v30 = vsub.f32 %v2180_v17, %v1206_v21  ;;  %v1209_v32 = vmul.f32 %v1207_v12, %v1207_v12 }
0x12ba   :  { %v1211_v23 = vsel %vm189_vm3, %v1209_v32, 0.0  ;;  %v1210_v31 = vmul.f32 %v1208_v30, %v1208_v30 }
0x12bb   :  { %1212 = vadd.xlane.f32.xlu0 %v1211_v23 }
0x12bc   :  { %v1214_v14 = vsel %vm189_vm3, %v1210_v31, 0.0  ;;  %v1539_v31 = vld [vmem:[#allocation2 + $0x60] ss:$0 sm:$0xff] }
0x12bd   :  { %1215 = vadd.xlane.f32.xlu1 %v1214_v14 }
0x1348   :  { %v1213_v34 = vpop.xlane.xlu0 %1212 }
0x1349   :  { %v1217_v36 = vmul.f32 0.03125, %v1213_v34 }
0x134a   :  { %v1216_v37 = vpop.xlane.xlu1 %1215 }
0x134b   :  { %v1219_v38 = vadd.f32 1e-05, %v1217_v36  ;;  %v1218_v39 = vmul.f32 0.03125, %v1216_v37  ;;  %v1540_v36 = vld [vmem:[#allocation2 + $0x61] ss:$0 sm:$0xff] }
0x134d   :  { %1842 = vrsqrt.f32 %v1219_v38  ;;  %v1220_v40 = vadd.f32 1e-05, %v1218_v39 }
0x134f   :  { %1844 = vrsqrt.f32 %v1220_v40  ;;  %v1541_v40 = vld [vmem:[#allocation2 + $0x62] ss:$0 sm:$0xff] }
0x1357   :  { %v1843_v26 = vpop.eup %1842 }
0x1358   :  { %v1223_v42 = vmul.f32 %v1843_v26, %v1207_v12 }
0x1359   :  { %v1845_v27 = vpop.eup %1844 }
0x135a   :  { %v1229_v43 = vmul.f32 %v1529_v41, %v1223_v42  ;;  %v1224_v44 = vmul.f32 %v1845_v27, %v1208_v30 }
0x135c   :  { %v1230_v46 = vmul.f32 %v1529_v41, %v1224_v44  ;;  %v1235_v47 = vadd.f32 %v1530_v45, %v1229_v43 }
0x135e   :  { %v1236_v48 = vadd.f32 %v1530_v45, %v1230_v46 }
0x1360   :  { %v1237_v49 = vpack.c.bf16 %v1236_v48, %v1235_v47 }
0x1362   :  { %1718 = vmatmul.mubr.msk.bf16.vlgmr.msra.gmra.mrb[28].mxu0 %vm189_vm3, %v1237_v49 }
0x1363   :  { %1733 = vmatprep.mubr.msk.bf16.mxu0 %vm1930_vm4, %v1929_v10  ;;  %1730 = vmatpush3.bf16.msra.mxu0 %v1796_v25 }
0x1364   :  { %1731 = vmatprep.subr.bf16.mxu0 %v1929_v10 }
0x1435   :  { %v1291_v53 = vpop.f32.mrb[28].mxu0 }
0x1436   :  { %v1292_v54 = vadd.f32 %v1531_v52, %v1291_v53  ;;  %v1719_v55 = vpop.f32.mrb[29].mxu0 }
0x1437   :  { %v1294_v56 = vpop.f32.mrb[30].mxu0 }
0x1438   :  { %v1295_v57 = vadd.f32 %v1531_v52, %v1294_v56  ;;  %v1720_v58 = vpop.f32.mrb[31].mxu0  ;;  %v1298_v59 = vmax.f32 %v1292_v54, 0.0 }
0x143a   :  { %v1299_v60 = vmax.f32 %v1295_v57, 0.0 }
0x143c   :  { %v1300_v61 = vpack.c.bf16 %v1299_v60, %v1298_v59 }
0x143e   :  { %1726 = vmatmul.mubr.msk.bf16.vlgmr.msra.gmra.mrb[32].mxu1 %vm189_vm3, %v1300_v61 }
0x1511   :  { %v1354_v62 = vpop.f32.mrb[32].mxu1 }
0x1512   :  { %v1355_v0 = vadd.f32 %v1535_v63, %v1354_v62  ;;  %v1727_v1 = vpop.f32.mrb[33].mxu1 }
0x1513   :  { %v1357_v2 = vpop.f32.mrb[34].mxu1 }
0x1514   :  { %v1358_v3 = vadd.f32 %v1535_v63, %v1357_v2  ;;  %v1728_v4 = vpop.f32.mrb[35].mxu1  ;;  %v1361_v5 = vadd.f32 %v1355_v0, %v2177_v18 }
0x1516   :  { %v1370_v6 = vsel %vm189_vm3, %v1361_v5, 0.0  ;;  %v1362_v7 = vadd.f32 %v1358_v3, %v2180_v17  ;;  %v1797_v17 = vld [vmem:[#allocation5 + $0x88] sm:$0xff]  }
0x1517   :  { %1371 = vadd.xlane.f32.xlu0 %v1370_v6  ;;  %1732 = vmatpush3.bf16.msra.mxu0 %v1797_v17 }
0x1518   :  { %v1373_v8 = vsel %vm189_vm3, %v1362_v7, 0.0 }
0x1519   :  { %1374 = vadd.xlane.f32.xlu1 %v1373_v8 }
0x15a4   :  { %v1372_v9 = vpop.xlane.xlu0 %1371 }
0x15a5   :  { %v1376_v11 = vmul.f32 0.03125, %v1372_v9 }
0x15a6   :  { %v1375_v13 = vpop.xlane.xlu1 %1374 }
0x15a7   :  { %v1378_v15 = vsub.f32 %v1361_v5, %v1376_v11  ;;  %v1377_v16 = vmul.f32 0.03125, %v1375_v13 }
0x15a9   :  { %v1379_v19 = vsub.f32 %v1362_v7, %v1377_v16  ;;  %v1380_v20 = vmul.f32 %v1378_v15, %v1378_v15 }
0x15ab   :  { %v1382_v22 = vsel %vm189_vm3, %v1380_v20, 0.0  ;;  %v1381_v24 = vmul.f32 %v1379_v19, %v1379_v19 }
0x15ac   :  { %1383 = vadd.xlane.f32.xlu0 %v1382_v22 }
0x15ad   :  { %v1385_v18 = vsel %vm189_vm3, %v1381_v24, 0.0 }
0x15ae   :  { %1386 = vadd.xlane.f32.xlu1 %v1385_v18 }
0x1639   :  { %v1384_v28 = vpop.xlane.xlu0 %1383 }
0x163a   :  { %v1388_v29 = vmul.f32 0.03125, %v1384_v28 }
0x163b   :  { %v1387_v12 = vpop.xlane.xlu1 %1386 }
0x163c   :  { %v1390_v21 = vadd.f32 1e-05, %v1388_v29  ;;  %v1389_v30 = vmul.f32 0.03125, %v1387_v12 }
0x163e   :  { %1846 = vrsqrt.f32 %v1390_v21  ;;  %v1391_v32 = vadd.f32 1e-05, %v1389_v30 }
0x1640   :  { %1848 = vrsqrt.f32 %v1391_v32 }
0x1648   :  { %v1847_v23 = vpop.eup %1846 }
0x1649   :  { %v1394_v14 = vmul.f32 %v1847_v23, %v1378_v15 }
0x164a   :  { %v1849_v33 = vpop.eup %1848 }
0x164b   :  { %v1400_v35 = vmul.f32 %v1539_v31, %v1394_v14  ;;  %v1395_v34 = vmul.f32 %v1849_v33, %v1379_v19 }
0x164d   :  { %v1401_v37 = vmul.f32 %v1539_v31, %v1395_v34  ;;  %v1406_v38 = vadd.f32 %v1540_v36, %v1400_v35 }
0x164f   :  { %v1407_v39 = vadd.f32 %v1540_v36, %v1401_v37 }
0x1651   :  { %v1408_v10 = vpack.c.bf16 %v1407_v39, %v1406_v38 }
0x1653   :  { %1734 = vmatmul.mubr.msk.bf16.vlgmr.msra.gmra.mrb[32].mxu0 %vm189_vm3, %v1408_v10 }
0x1726   :  { %v1462_v26 = vpop.f32.mrb[32].mxu0 }
0x1727   :  { %v1463_v41 = vadd.f32 %v1541_v40, %v1462_v26  ;;  %v1735_v42 = vpop.f32.mrb[33].mxu0 }
0x1728   :  { %v1465_v27 = vpop.f32.mrb[34].mxu0 }
0x1729   :  { %1469 = vst [vmem:[#allocation7] sm:$0xff] %v1463_v41  ;;  %v1466_v43 = vadd.f32 %v1541_v40, %v1465_v27  ;;  %v1736_v44 = vpop.f32.mrb[35].mxu0 }
0x172b   :  { %1470 = vst [vmem:[#allocation7 + $0x8] sm:$0xff] %v1466_v43 }
0x172c   :  { %1905 = shalt.err (!%p1902_p6)
}
0x172d   :  { %s1906_s26 = scalar_lea.hbm %s2223_s3, 256 }
0x172e   :  { %p1907_p7 = scmp.ne.s32.totalorder %s2223_s3, %s1906_s26  ;;  %p1910_p8 = scmp.lt.u32.totalorder %s1906_s26, %s2223_s3 }
0x1730   :  { %p1912_p9 = pnand %p1910_p8, %p1907_p7 }
0x1732   :  { %1915 = shalt.err (!%p1912_p9)
}
0x1733   :  { %1482 = dma.vmem_to_hbm [thread:$0]  %s1477_s20, 256, %s2223_s3, [#allocation4], %s1923_s22, %s1923_s22, %s1924_s23  }
0x1734   :  { %1920 = dma.done.wait [#allocation4], 256  }
0x1735   :  { %1921 = vsyncadd [#allocation4], 4294967040 }
0x1736   :  { %1486 = vsyncpa [#allocation3], 1 }
0x1737   :  { %1487 = vsyncpa [#allocation6], 1 }
0x1738   :  { %1488 = vsyncpa [#allocation4], 1 }

</bundles_post_ra>
